<compile_context>
chip_gen: v6e
topology: v6e:2x2x1
jax: 0.10.0
libtpu: 0.0.40
codegen_flags: <defaults>
</compile_context>

<pallas_src>
import functools
import math

import jax
import jax.numpy as jnp
from jax.experimental import pallas as pl
from jax.experimental.pallas import tpu as pltpu

HID1 = 128
HID2 = 256


def _round_up(x, m):
    return ((x + m - 1) // m) * m


def _mlp_kernel(x_ref, w1_ref, b1_ref, w2_ref, b2_ref, w3_ref, b3_ref, o_ref):
    # Layer 1: (tb, in)bf16 @ (in, 128)bf16 -> f32 acc; bias + ReLU in f32.
    h1 = jnp.dot(x_ref[...], w1_ref[...], preferred_element_type=jnp.float32)
    h1 = jnp.maximum(h1 + b1_ref[...], 0.0)
    # Layer 2: (tb, 128)bf16 @ (128, 256)bf16 -> f32.
    h2 = jnp.dot(h1.astype(jnp.bfloat16), w2_ref[...],
                 preferred_element_type=jnp.float32)
    h2 = jnp.maximum(h2 + b2_ref[...], 0.0)
    # Layer 3: (tb, 256)bf16 @ (256, out_pad)bf16 -> f32; lane-dense (x128) store.
    out = jnp.dot(h2.astype(jnp.bfloat16), w3_ref[...],
                  preferred_element_type=jnp.float32)
    o_ref[...] = (out + b3_ref[...]).astype(o_ref.dtype)


@functools.partial(jax.jit, static_argnames=("block_b", "single_buffer_weights"))
def bc_model_forward(x, w1, b1, w2, b2, w3, b3, *, block_b=128,
                     single_buffer_weights=True):
    B, in_size = x.shape
    out_size = w3.shape[1]
    assert block_b % 8 == 0, "block_b must be a multiple of 8"

    # Pad batch so it tiles by block_b; pad out_size up to a lane-dense multiple of 128.
    b_pad = _round_up(B, block_b)
    out_pad = _round_up(out_size, 128)

    if b_pad != B:
        x = jnp.pad(x, ((0, b_pad - B), (0, 0)))
    if out_pad != out_size:
        w3 = jnp.pad(w3, ((0, 0), (0, out_pad - out_size)))
        b3 = jnp.pad(b3, ((0, 0), (0, out_pad - out_size)))

    # bf16 operands into the MXU; biases stay f32 (bias-add / ReLU done in f32).
    x = x.astype(jnp.bfloat16)
    w1 = w1.astype(jnp.bfloat16)
    w2 = w2.astype(jnp.bfloat16)
    w3 = w3.astype(jnp.bfloat16)

    grid = (b_pad // block_b,)

    def _resident(shape):
        # Same block every grid step -> never re-fetched; single-buffer to save VMEM.
        if single_buffer_weights:
            return pl.BlockSpec(shape, lambda i: (0, 0),
                                pipeline_mode=pl.Buffered(1))
        return pl.BlockSpec(shape, lambda i: (0, 0))

    flops = 2 * b_pad * (in_size * HID1 + HID1 * HID2 + HID2 * out_pad)
    bytes_accessed = (
        b_pad * in_size * 2 + b_pad * out_pad * 4                  # activations in/out
        + (in_size * HID1 + HID1 * HID2 + HID2 * out_pad) * 2      # bf16 weights
        + (HID1 + HID2 + out_pad) * 4                              # f32 biases
    )

    out = pl.pallas_call(
        _mlp_kernel,
        out_shape=jax.ShapeDtypeStruct((b_pad, out_pad), jnp.float32),
        grid_spec=pl.GridSpec(
            grid=grid,
            in_specs=[
                pl.BlockSpec((block_b, in_size), lambda i: (i, 0)),  # x, batch-tiled
                _resident((in_size, HID1)),   # W1
                _resident((1, HID1)),         # b1
                _resident((HID1, HID2)),      # W2
                _resident((1, HID2)),         # b2
                _resident((HID2, out_pad)),   # W3 (out padded to multiple of 128)
                _resident((1, out_pad)),      # b3
            ],
            out_specs=pl.BlockSpec((block_b, out_pad), lambda i: (i, 0)),
        ),
        compiler_params=pltpu.CompilerParams(
            dimension_semantics=("parallel",),
            vmem_limit_bytes=32 * 1024 * 1024,
        ),
        cost_estimate=pl.CostEstimate(
            flops=flops, transcendentals=0, bytes_accessed=bytes_accessed),
    )(x, w1, b1, w2, b2, w3, b3)

    # Strip batch padding and the lane-padding of the output features (cheap slice).
    return out[:B, :out_size]


def init_linear_params(key, fan_in, fan_out):
    """Deterministic init mimicking PyTorch nn.Linear default (uniform +/- 1/sqrt(fan_in))."""
    kw, kb = jax.random.split(key)
    bound = 1.0 / math.sqrt(fan_in)
    # Stored as (in, out) so forward is x @ W + b.
    w = jax.random.uniform(kw, (fan_in, fan_out), jnp.float32, -bound, bound)
    b = jax.random.uniform(kb, (1, fan_out), jnp.float32, -bound, bound)
    return w, b


def reference_forward_f32(x, w1, b1, w2, b2, w3, b3):
    h1 = jnp.maximum(x @ w1 + b1, 0.0)
    h2 = jnp.maximum(h1 @ w2 + b2, 0.0)
    return h2 @ w3 + b3


def reference_forward_bf16(x, w1, b1, w2, b2, w3, b3):
    """Mirrors the kernel's mixed-precision scheme (bf16 operands, f32 accum)."""
    bf = jnp.bfloat16
    h1 = jnp.dot(x.astype(bf), w1.astype(bf), preferred_element_type=jnp.float32)
    h1 = jnp.maximum(h1 + b1, 0.0)
    h2 = jnp.dot(h1.astype(bf), w2.astype(bf), preferred_element_type=jnp.float32)
    h2 = jnp.maximum(h2 + b2, 0.0)
    out = jnp.dot(h2.astype(bf), w3.astype(bf), preferred_element_type=jnp.float32)
    return out + b3


if __name__ == "__main__":
    # Small shapes consistent with the module; B=240 is deliberately NOT a
    # multiple of block_b to exercise the padding path, and pads to 256 so the
    # grid has 2 steps (keeps both TensorCores busy on v7x).
    B, in_size, out_size = 240, 32, 8
    block_b = 128

    key = jax.random.PRNGKey(0)
    kx, k1, k2, k3 = jax.random.split(key, 4)

    x = jax.random.normal(kx, (B, in_size), jnp.float32)
    w1, b1 = init_linear_params(k1, in_size, HID1)
    w2, b2 = init_linear_params(k2, HID1, HID2)
    w3, b3 = init_linear_params(k3, HID2, out_size)

    try:
        out = jax.block_until_ready(
            bc_model_forward(x, w1, b1, w2, b2, w3, b3,
                             block_b=block_b, single_buffer_weights=True))
    except Exception:
        # This JAX build rejected pipeline_mode=pl.Buffered(1); fall back to the
        # default double-buffered weight blocks (correctness & other opts intact).
        out = jax.block_until_ready(
            bc_model_forward(x, w1, b1, w2, b2, w3, b3,
                             block_b=block_b, single_buffer_weights=False))

    assert out.shape == (B, out_size)

    ref_bf16 = reference_forward_bf16(x, w1, b1, w2, b2, w3, b3)
    ref_f32 = reference_forward_f32(x, w1, b1, w2, b2, w3, b3)
    # Tight check against a reference using the identical mixed-precision scheme.
    assert jnp.allclose(out, ref_bf16, atol=1e-2, rtol=1e-2), "mismatch vs bf16 reference"
    # Loose check against the full-f32 PyTorch-equivalent semantics.
    assert jnp.allclose(out, ref_f32, atol=5e-2, rtol=5e-2), "mismatch vs f32 reference"

    print("KERNEL_OK")
</pallas_src>

<mosaic_0001>
module attributes {stable_mosaic.version = 11 : i64} {
  func.func @_mlp_kernel(%arg0: i32, %arg1: memref<128x32xbf16, #tpu.memory_space<vmem>>, %arg2: memref<32x128xbf16, #tpu.memory_space<vmem>>, %arg3: memref<1x128xf32, #tpu.memory_space<vmem>>, %arg4: memref<128x256xbf16, #tpu.memory_space<vmem>>, %arg5: memref<1x256xf32, #tpu.memory_space<vmem>>, %arg6: memref<256x128xbf16, #tpu.memory_space<vmem>>, %arg7: memref<1x128xf32, #tpu.memory_space<vmem>>, %arg8: memref<128x128xf32, #tpu.memory_space<vmem>>) attributes {dimension_semantics = [#tpu.dimension_semantics<parallel>], iteration_bounds = array<i64: 2>, scalar_prefetch = 0 : i64, scratch_operands = 0 : i64, tpu.core_type = #tpu.core_type<tc>, window_params = [{transform_indices = @transform_0, window_bounds = array<i64: 128, 32>}, {pipeline_mode = #tpu.pipeline_mode<synchronous>, transform_indices = @transform_1, window_bounds = array<i64: 32, 128>}, {pipeline_mode = #tpu.pipeline_mode<synchronous>, transform_indices = @transform_2, window_bounds = array<i64: 1, 128>}, {pipeline_mode = #tpu.pipeline_mode<synchronous>, transform_indices = @transform_3, window_bounds = array<i64: 128, 256>}, {pipeline_mode = #tpu.pipeline_mode<synchronous>, transform_indices = @transform_4, window_bounds = array<i64: 1, 256>}, {pipeline_mode = #tpu.pipeline_mode<synchronous>, transform_indices = @transform_5, window_bounds = array<i64: 256, 128>}, {pipeline_mode = #tpu.pipeline_mode<synchronous>, transform_indices = @transform_6, window_bounds = array<i64: 1, 128>}, {transform_indices = @transform_7, window_bounds = array<i64: 128, 128>}]} {
    %c0 = arith.constant 0 : index
    %c0_0 = arith.constant 0 : index
    %0 = vector.load %arg1[%c0, %c0_0] : memref<128x32xbf16, #tpu.memory_space<vmem>>, vector<128x32xbf16>
    %c0_1 = arith.constant 0 : index
    %c0_2 = arith.constant 0 : index
    %1 = vector.load %arg2[%c0_1, %c0_2] : memref<32x128xbf16, #tpu.memory_space<vmem>>, vector<32x128xbf16>
    %cst = arith.constant dense<0.000000e+00> : vector<128x128xf32>
    %2 = tpu.matmul %0, %1, %cst {dimension_numbers = #tpu.dot_dimension_numbers<[1], [0], [0], [1], [0, 0, 1, 1], [], []>} : vector<128x32xbf16>, vector<32x128xbf16>, vector<128x128xf32> -> vector<128x128xf32>
    %c0_3 = arith.constant 0 : index
    %c0_4 = arith.constant 0 : index
    %3 = vector.load %arg3[%c0_3, %c0_4] : memref<1x128xf32, #tpu.memory_space<vmem>>, vector<1x128xf32>
    %4 = vector.broadcast %3 : vector<1x128xf32> to vector<128x128xf32>
    %5 = arith.addf %2, %4 : vector<128x128xf32>
    %cst_5 = arith.constant 0.000000e+00 : f32
    %6 = vector.broadcast %cst_5 : f32 to vector<128x128xf32>
    %7 = arith.maximumf %5, %6 : vector<128x128xf32>
    %8 = arith.truncf %7 : vector<128x128xf32> to vector<128x128xbf16>
    %c0_6 = arith.constant 0 : index
    %c0_7 = arith.constant 0 : index
    %9 = vector.load %arg4[%c0_6, %c0_7] : memref<128x256xbf16, #tpu.memory_space<vmem>>, vector<128x256xbf16>
    %cst_8 = arith.constant dense<0.000000e+00> : vector<128x256xf32>
    %10 = tpu.matmul %8, %9, %cst_8 {dimension_numbers = #tpu.dot_dimension_numbers<[1], [0], [0], [1], [0, 0, 1, 1], [], []>} : vector<128x128xbf16>, vector<128x256xbf16>, vector<128x256xf32> -> vector<128x256xf32>
    %c0_9 = arith.constant 0 : index
    %c0_10 = arith.constant 0 : index
    %11 = vector.load %arg5[%c0_9, %c0_10] : memref<1x256xf32, #tpu.memory_space<vmem>>, vector<1x256xf32>
    %12 = vector.broadcast %11 : vector<1x256xf32> to vector<128x256xf32>
    %13 = arith.addf %10, %12 : vector<128x256xf32>
    %cst_11 = arith.constant 0.000000e+00 : f32
    %14 = vector.broadcast %cst_11 : f32 to vector<128x256xf32>
    %15 = arith.maximumf %13, %14 : vector<128x256xf32>
    %16 = arith.truncf %15 : vector<128x256xf32> to vector<128x256xbf16>
    %c0_12 = arith.constant 0 : index
    %c0_13 = arith.constant 0 : index
    %17 = vector.load %arg6[%c0_12, %c0_13] : memref<256x128xbf16, #tpu.memory_space<vmem>>, vector<256x128xbf16>
    %cst_14 = arith.constant dense<0.000000e+00> : vector<128x128xf32>
    %18 = tpu.matmul %16, %17, %cst_14 {dimension_numbers = #tpu.dot_dimension_numbers<[1], [0], [0], [1], [0, 0, 1, 1], [], []>} : vector<128x256xbf16>, vector<256x128xbf16>, vector<128x128xf32> -> vector<128x128xf32>
    %c0_15 = arith.constant 0 : index
    %c0_16 = arith.constant 0 : index
    %19 = vector.load %arg7[%c0_15, %c0_16] : memref<1x128xf32, #tpu.memory_space<vmem>>, vector<1x128xf32>
    %20 = vector.broadcast %19 : vector<1x128xf32> to vector<128x128xf32>
    %21 = arith.addf %18, %20 : vector<128x128xf32>
    %c0_17 = arith.constant 0 : index
    %c0_18 = arith.constant 0 : index
    %22 = vector.load %arg8[%c0_17, %c0_18] : memref<128x128xf32, #tpu.memory_space<vmem>>, vector<128x128xf32>
    tpu.vector_store %arg8[%c0_17, %c0_18], %21 {strides = array<i32>} : memref<128x128xf32, #tpu.memory_space<vmem>>, vector<128x128xf32>,
    return
  }
  func.func @transform_0(%arg0: i32) -> (i32, i32) {
    %c0_i32 = arith.constant 0 : i32
    %c0_i32_0 = arith.constant 0 : i32
    return %arg0, %c0_i32 : i32, i32
  }
  func.func @transform_1(%arg0: i32) -> (i32, i32) {
    %c0_i32 = arith.constant 0 : i32
    %c0_i32_0 = arith.constant 0 : i32
    %c0_i32_1 = arith.constant 0 : i32
    return %c0_i32, %c0_i32_0 : i32, i32
  }
  func.func @transform_2(%arg0: i32) -> (i32, i32) {
    %c0_i32 = arith.constant 0 : i32
    %c0_i32_0 = arith.constant 0 : i32
    %c0_i32_1 = arith.constant 0 : i32
    return %c0_i32, %c0_i32_0 : i32, i32
  }
  func.func @transform_3(%arg0: i32) -> (i32, i32) {
    %c0_i32 = arith.constant 0 : i32
    %c0_i32_0 = arith.constant 0 : i32
    %c0_i32_1 = arith.constant 0 : i32
    return %c0_i32, %c0_i32_0 : i32, i32
  }
  func.func @transform_4(%arg0: i32) -> (i32, i32) {
    %c0_i32 = arith.constant 0 : i32
    %c0_i32_0 = arith.constant 0 : i32
    %c0_i32_1 = arith.constant 0 : i32
    return %c0_i32, %c0_i32_0 : i32, i32
  }
  func.func @transform_5(%arg0: i32) -> (i32, i32) {
    %c0_i32 = arith.constant 0 : i32
    %c0_i32_0 = arith.constant 0 : i32
    %c0_i32_1 = arith.constant 0 : i32
    return %c0_i32, %c0_i32_0 : i32, i32
  }
  func.func @transform_6(%arg0: i32) -> (i32, i32) {
    %c0_i32 = arith.constant 0 : i32
    %c0_i32_0 = arith.constant 0 : i32
    %c0_i32_1 = arith.constant 0 : i32
    return %c0_i32, %c0_i32_0 : i32, i32
  }
  func.func @transform_7(%arg0: i32) -> (i32, i32) {
    %c0_i32 = arith.constant 0 : i32
    %c0_i32_0 = arith.constant 0 : i32
    return %arg0, %c0_i32 : i32, i32
  }
}

module attributes {stable_mosaic.version = 11 : i64} {
  func.func @_mlp_kernel(%arg0: i32, %arg1: memref<128x32xbf16, #tpu.memory_space<vmem>>, %arg2: memref<32x128xbf16, #tpu.memory_space<vmem>>, %arg3: memref<1x128xf32, #tpu.memory_space<vmem>>, %arg4: memref<128x256xbf16, #tpu.memory_space<vmem>>, %arg5: memref<1x256xf32, #tpu.memory_space<vmem>>, %arg6: memref<256x128xbf16, #tpu.memory_space<vmem>>, %arg7: memref<1x128xf32, #tpu.memory_space<vmem>>, %arg8: memref<128x128xf32, #tpu.memory_space<vmem>>) attributes {dimension_semantics = [#tpu.dimension_semantics<parallel>], iteration_bounds = array<i64: 2>, scalar_prefetch = 0 : i64, scratch_operands = 0 : i64, tpu.core_type = #tpu.core_type<tc>, window_params = [{transform_indices = @transform_0, window_bounds = array<i64: 128, 32>}, {pipeline_mode = #tpu.pipeline_mode<synchronous>, transform_indices = @transform_1, window_bounds = array<i64: 32, 128>}, {pipeline_mode = #tpu.pipeline_mode<synchronous>, transform_indices = @transform_2, window_bounds = array<i64: 1, 128>}, {pipeline_mode = #tpu.pipeline_mode<synchronous>, transform_indices = @transform_3, window_bounds = array<i64: 128, 256>}, {pipeline_mode = #tpu.pipeline_mode<synchronous>, transform_indices = @transform_4, window_bounds = array<i64: 1, 256>}, {pipeline_mode = #tpu.pipeline_mode<synchronous>, transform_indices = @transform_5, window_bounds = array<i64: 256, 128>}, {pipeline_mode = #tpu.pipeline_mode<synchronous>, transform_indices = @transform_6, window_bounds = array<i64: 1, 128>}, {transform_indices = @transform_7, window_bounds = array<i64: 128, 128>}]} {
    %c0 = arith.constant 0 : index
    %c0_0 = arith.constant 0 : index
    %0 = vector.load %arg1[%c0, %c0_0] : memref<128x32xbf16, #tpu.memory_space<vmem>>, vector<128x32xbf16>
    %c0_1 = arith.constant 0 : index
    %c0_2 = arith.constant 0 : index
    %1 = vector.load %arg2[%c0_1, %c0_2] : memref<32x128xbf16, #tpu.memory_space<vmem>>, vector<32x128xbf16>
    %cst = arith.constant dense<0.000000e+00> : vector<128x128xf32>
    %2 = tpu.matmul %0, %1, %cst {dimension_numbers = #tpu.dot_dimension_numbers<[1], [0], [0], [1], [0, 0, 1, 1], [], []>} : vector<128x32xbf16>, vector<32x128xbf16>, vector<128x128xf32> -> vector<128x128xf32>
    %c0_3 = arith.constant 0 : index
    %c0_4 = arith.constant 0 : index
    %3 = vector.load %arg3[%c0_3, %c0_4] : memref<1x128xf32, #tpu.memory_space<vmem>>, vector<1x128xf32>
    %4 = vector.broadcast %3 : vector<1x128xf32> to vector<128x128xf32>
    %5 = arith.addf %2, %4 : vector<128x128xf32>
    %cst_5 = arith.constant 0.000000e+00 : f32
    %6 = vector.broadcast %cst_5 : f32 to vector<128x128xf32>
    %7 = arith.maximumf %5, %6 : vector<128x128xf32>
    %8 = arith.truncf %7 : vector<128x128xf32> to vector<128x128xbf16>
    %c0_6 = arith.constant 0 : index
    %c0_7 = arith.constant 0 : index
    %9 = vector.load %arg4[%c0_6, %c0_7] : memref<128x256xbf16, #tpu.memory_space<vmem>>, vector<128x256xbf16>
    %cst_8 = arith.constant dense<0.000000e+00> : vector<128x256xf32>
    %10 = tpu.matmul %8, %9, %cst_8 {dimension_numbers = #tpu.dot_dimension_numbers<[1], [0], [0], [1], [0, 0, 1, 1], [], []>} : vector<128x128xbf16>, vector<128x256xbf16>, vector<128x256xf32> -> vector<128x256xf32>
    %c0_9 = arith.constant 0 : index
    %c0_10 = arith.constant 0 : index
    %11 = vector.load %arg5[%c0_9, %c0_10] : memref<1x256xf32, #tpu.memory_space<vmem>>, vector<1x256xf32>
    %12 = vector.broadcast %11 : vector<1x256xf32> to vector<128x256xf32>
    %13 = arith.addf %10, %12 : vector<128x256xf32>
    %cst_11 = arith.constant 0.000000e+00 : f32
    %14 = vector.broadcast %cst_11 : f32 to vector<128x256xf32>
    %15 = arith.maximumf %13, %14 : vector<128x256xf32>
    %16 = arith.truncf %15 : vector<128x256xf32> to vector<128x256xbf16>
    %c0_12 = arith.constant 0 : index
    %c0_13 = arith.constant 0 : index
    %17 = vector.load %arg6[%c0_12, %c0_13] : memref<256x128xbf16, #tpu.memory_space<vmem>>, vector<256x128xbf16>
    %cst_14 = arith.constant dense<0.000000e+00> : vector<128x128xf32>
    %18 = tpu.matmul %16, %17, %cst_14 {dimension_numbers = #tpu.dot_dimension_numbers<[1], [0], [0], [1], [0, 0, 1, 1], [], []>} : vector<128x256xbf16>, vector<256x128xbf16>, vector<128x128xf32> -> vector<128x128xf32>
    %c0_15 = arith.constant 0 : index
    %c0_16 = arith.constant 0 : index
    %19 = vector.load %arg7[%c0_15, %c0_16] : memref<1x128xf32, #tpu.memory_space<vmem>>, vector<1x128xf32>
    %20 = vector.broadcast %19 : vector<1x128xf32> to vector<128x128xf32>
    %21 = arith.addf %18, %20 : vector<128x128xf32>
    %c0_17 = arith.constant 0 : index
    %c0_18 = arith.constant 0 : index
    %22 = vector.load %arg8[%c0_17, %c0_18] : memref<128x128xf32, #tpu.memory_space<vmem>>, vector<128x128xf32>
    tpu.vector_store %arg8[%c0_17, %c0_18], %21 {strides = array<i32>} : memref<128x128xf32, #tpu.memory_space<vmem>>, vector<128x128xf32>,
    return
  }
  func.func @transform_0(%arg0: i32) -> (i32, i32) {
    %c0_i32 = arith.constant 0 : i32
    %c0_i32_0 = arith.constant 0 : i32
    return %arg0, %c0_i32 : i32, i32
  }
  func.func @transform_1(%arg0: i32) -> (i32, i32) {
    %c0_i32 = arith.constant 0 : i32
    %c0_i32_0 = arith.constant 0 : i32
    %c0_i32_1 = arith.constant 0 : i32
    return %c0_i32, %c0_i32_0 : i32, i32
  }
  func.func @transform_2(%arg0: i32) -> (i32, i32) {
    %c0_i32 = arith.constant 0 : i32
    %c0_i32_0 = arith.constant 0 : i32
    %c0_i32_1 = arith.constant 0 : i32
    return %c0_i32, %c0_i32_0 : i32, i32
  }
  func.func @transform_3(%arg0: i32) -> (i32, i32) {
    %c0_i32 = arith.constant 0 : i32
    %c0_i32_0 = arith.constant 0 : i32
    %c0_i32_1 = arith.constant 0 : i32
    return %c0_i32, %c0_i32_0 : i32, i32
  }
  func.func @transform_4(%arg0: i32) -> (i32, i32) {
    %c0_i32 = arith.constant 0 : i32
    %c0_i32_0 = arith.constant 0 : i32
    %c0_i32_1 = arith.constant 0 : i32
    return %c0_i32, %c0_i32_0 : i32, i32
  }
  func.func @transform_5(%arg0: i32) -> (i32, i32) {
    %c0_i32 = arith.constant 0 : i32
    %c0_i32_0 = arith.constant 0 : i32
    %c0_i32_1 = arith.constant 0 : i32
    return %c0_i32, %c0_i32_0 : i32, i32
  }
  func.func @transform_6(%arg0: i32) -> (i32, i32) {
    %c0_i32 = arith.constant 0 : i32
    %c0_i32_0 = arith.constant 0 : i32
    %c0_i32_1 = arith.constant 0 : i32
    return %c0_i32, %c0_i32_0 : i32, i32
  }
  func.func @transform_7(%arg0: i32) -> (i32, i32) {
    %c0_i32 = arith.constant 0 : i32
    %c0_i32_0 = arith.constant 0 : i32
    return %arg0, %c0_i32 : i32, i32
  }
}

</mosaic_0001>

<bundles_post_ra>
// kernel: bc_model_forward.1
= control target key start
LH: loop header
LB: loop body
LE: loop exit
PB: predicated region body
PF: predicated region fallthrough
CT: control target
= control target key end

     0   :  { %s1346_s24 = smov 0   ;;  %s1576_s0 = inlined_call_operand.vmem [shape: bf16[256,32], index: 0, kind: input, shape index: {}]   ;;  %s1577_s1 = inlined_call_operand.vmem [shape: bf16[32,128], index: 1, kind: input, shape index: {}]   ;;  %s1578_s2 = inlined_call_operand.vmem [shape: f32[1,128], index: 2, kind: input, shape index: {}]   ;;  %s1579_s3 = inlined_call_operand.vmem [shape: bf16[128,256], index: 3, kind: input, shape index: {}]   ;;  %s1580_s4 = inlined_call_operand.vmem [shape: f32[1,256], index: 4, kind: input, shape index: {}]   ;;  %s1581_s5 = inlined_call_operand.vmem [shape: bf16[256,128], index: 5, kind: input, shape index: {}]   ;;  %s1582_s6 = inlined_call_operand.vmem [shape: f32[1,128], index: 6, kind: input, shape index: {}]   ;;  %s1583_s7 = inlined_call_operand.vmem [shape: f32[256,128], index: 7, kind: output, shape index: {}]  }
   0x1 LB: > { %s1081_s25 = sadd.s32 4294967295, %s1303_s24   ;;  %p1085_p0 = scmp.ge.s32.totalorder %s1303_s24, 1  ;;  %s1303_s24 = sphi %s1346_s24, %s17_s24  }
   0x2   : > { %p238_p1 = scmp.lt.s32.totalorder %s1303_s24, 3 }
   0x4   : > { %p239_p2 = pnand %p1085_p0, %p238_p1 }
   0x5   : > { %s1086_s28 = sshll.u32 (!%p239_p2), %s1081_s25, 4 }
   0x6   : > { %242 = sbr.rel (%p239_p2) target bundleno = 691 (0x2b3), region = 48  ;;  %p271_p3 = scmp.lt.s32.totalorder (!%p239_p2), %s1086_s28, 31 }
   0xb   : > { %v1247_v0 = vld [vmem:[%s1577_s1 + $0x8] sm:$0xff]   ;;  %v1248_v1 = vld [vmem:[%s1577_s1] sm:$0xff]   ;;  %v1257_v2 = vld [vmem:[%s1579_s3 + $0x74] ss:$8 sps:$4 sm:$0xff]   ;;  %s1585_s28 = smov (!%p271_p3, %s1086_s28), 31  ;;  %vm362_vm0 = vcmask 261120  }
   0xc   : > { %1218 = vmatprep.subr.bf16.mxu0 %v1247_v0  ;;  %v1259_v3 = vld [vmem:[%s1579_s3 + $0x70] ss:$8 sps:$4 sm:$0xff]   ;;  %616 = vmatprep.subr.bf16.mxu1 %v1257_v2  ;;  %v1260_v4 = vld [vmem:[%s1579_s3 + $0x64] ss:$8 sps:$4 sm:$0xff]   ;;  %s1087_s14 = sshll.u32 %s1585_s28, 2  ;;  %v1305_v26 = vmov 0  }
   0xd   : > { %1219 = vmatpush3.bf16.msra.mxu0 %v1247_v0  ;;  %617 = vmatpush1.bf16.msra.mxu1 %v1259_v3  ;;  %v1262_v5 = vld [vmem:[%s1579_s3 + $0x60] ss:$8 sps:$4 sm:$0xff]   ;;  %s1378_s19 = scalar_lea.vmem %s1576_s0, %s1087_s14  ;;  %v1263_v6 = vld [vmem:[%s1579_s3 + $0x54] ss:$8 sps:$4 sm:$0xff]   ;;  %v1265_v8 = vld [vmem:[%s1579_s3 + $0x50] ss:$8 sps:$4 sm:$0xff]  }
   0xe   : > { %1220 = vmatprep.subr.bf16.mxu0 %v1248_v1  ;;  %618 = vmatprep.subr.bf16.mxu1 %v1260_v4  ;;  %v1249_v7 = vld [vmem:[%s1378_s19] sm:$0xff]   ;;  %v1250_v9 = vld [vmem:[%s1378_s19 + $0x8] sm:$0xff]   ;;  %v1251_v10 = vld [vmem:[%s1378_s19 + $0x10] sm:$0xff]   ;;  %s1089_s17 = sshll.u32 %s1585_s28, 3 }
   0xf   : > { %1222 = vmatprep.mubr.msk.bf16.mxu0 %vm362_vm0, %v1249_v7  ;;  %v1266_v11 = vld [vmem:[%s1579_s3 + $0x44] ss:$8 sps:$4 sm:$0xff]   ;;  %v1252_v12 = vld [vmem:[%s1378_s19 + $0x18] sm:$0xff]   ;;  %v1268_v14 = vld [vmem:[%s1579_s3 + $0x40] ss:$8 sps:$4 sm:$0xff]   ;;  %648 = vmatprep.mubr.bf16.mxu1 %v1305_v26  ;;  %s1539_s22 = scalar_lea.vmem %s1583_s7, %s1089_s17 }
  0x10   : > { %v1253_v13 = vld [vmem:[%s1378_s19 + $0x20] sm:$0xff]   ;;  %v1269_v15 = vld [vmem:[%s1579_s3 + $0x34] ss:$8 sps:$4 sm:$0xff]   ;;  %v1271_v16 = vld [vmem:[%s1579_s3 + $0x30] ss:$8 sps:$4 sm:$0xff]  }
  0x11   : > { %1221 = vmatpush3.bf16.msra.mxu0 %v1248_v1  ;;  %619 = vmatpush1.bf16.msra.mxu1 %v1262_v5  ;;  %v1254_v17 = vld [vmem:[%s1378_s19 + $0x28] sm:$0xff]   ;;  %v1255_v18 = vld [vmem:[%s1378_s19 + $0x30] sm:$0xff]   ;;  %v1256_v19 = vld [vmem:[%s1378_s19 + $0x38] sm:$0xff]  }
  0x12   : > { %620 = vmatprep.subr.bf16.mxu1 %v1263_v6  ;;  %v1272_v20 = vld [vmem:[%s1579_s3 + $0x24] ss:$8 sps:$4 sm:$0xff]   ;;  %v1274_v21 = vld [vmem:[%s1579_s3 + $0x20] ss:$8 sps:$4 sm:$0xff]   ;;  %v1275_v22 = vld [vmem:[%s1579_s3 + $0x14] ss:$8 sps:$4 sm:$0xff]  }
  0x13   : > { %v1277_v23 = vld [vmem:[%s1579_s3 + $0x10] ss:$8 sps:$4 sm:$0xff]   ;;  %v1278_v24 = vld [vmem:[%s1579_s3 + $0x4] ss:$8 sps:$4 sm:$0xff]   ;;  %v1280_v25 = vld [vmem:[%s1579_s3] ss:$8 sps:$4 sm:$0xff]  }
  0x14   : > { %1223 = vmatmul.mubr.msk.bf16.vlgmr.msra.gmra.mxu0 %vm362_vm0, %v1250_v9  ;;  %v1281_v27 = vld [vmem:[%s1581_s5 + $0x78] sm:$0xff]   ;;  %v1283_v29 = vld [vmem:[%s1581_s5 + $0x70] sm:$0xff]   ;;  %v1285_v31 = vld [vmem:[%s1581_s5 + $0x68] sm:$0xff]  }
  0x15   : > { %1226 = vmatprep.mubr.msk.bf16.mxu0 %vm362_vm0, %v1251_v10  ;;  %621 = vmatpush1.bf16.msra.mxu1 %v1265_v8  ;;  %v1282_v28 = vld [vmem:[%s1581_s5 + $0x38] sm:$0xff]   ;;  %v1284_v30 = vld [vmem:[%s1581_s5 + $0x30] sm:$0xff]   ;;  %v1286_v32 = vld [vmem:[%s1581_s5 + $0x28] sm:$0xff]  }
  0x16   : > { %622 = vmatprep.subr.bf16.mxu1 %v1266_v11  ;;  %1154 = vmatprep.subr.bf16.mxu0 %v1281_v27  ;;  %v1287_v33 = vld [vmem:[%s1581_s5 + $0x60] sm:$0xff]   ;;  %v1289_v35 = vld [vmem:[%s1581_s5 + $0x58] sm:$0xff]  }
  0x17   : > { %1155 = vmatpush3.bf16.msra.mxu0 %v1282_v28  ;;  %v1288_v34 = vld [vmem:[%s1581_s5 + $0x20] sm:$0xff]   ;;  %v1290_v36 = vld [vmem:[%s1581_s5 + $0x18] sm:$0xff]  }
  0x18   : > { %1156 = vmatprep.subr.bf16.mxu0 %v1283_v29  ;;  %v1090_v39 = vld [vmem:[%s1578_s2] ss:$0 sm:$0xff] }
  0x19   : > { %623 = vmatpush1.bf16.msra.mxu1 %v1268_v14 }
  0x1a   : > { %624 = vmatprep.subr.bf16.mxu1 %v1269_v15 }
  0x1b   : > { %1157 = vmatpush3.bf16.msra.mxu0 %v1284_v30 }
  0x1c   : > { %1227 = vmatmul.mubr.msk.bf16.gmra.mxu0 %vm362_vm0, %v1252_v12  ;;  %1158 = vmatprep.subr.bf16.mxu0 %v1285_v31  ;;  %v1291_v31 = vld [vmem:[%s1581_s5 + $0x50] sm:$0xff]  }
  0x1d   : > { %1230 = vmatprep.mubr.msk.bf16.mxu0 %vm362_vm0, %v1253_v13  ;;  %625 = vmatpush1.bf16.msra.mxu1 %v1271_v16 }
  0x1e   : > { %626 = vmatprep.subr.bf16.mxu1 %v1272_v20 }
  0x1f   : > { %1159 = vmatpush3.bf16.msra.mxu0 %v1286_v32  ;;  %v1292_v32 = vld [vmem:[%s1581_s5 + $0x10] sm:$0xff]  }
  0x20   : > { %1160 = vmatprep.subr.bf16.mxu0 %v1287_v33  ;;  %v1293_v33 = vld [vmem:[%s1581_s5 + $0x48] sm:$0xff]  }
  0x21   : > { %627 = vmatpush1.bf16.msra.mxu1 %v1274_v21 }
  0x22   : > { %628 = vmatprep.subr.bf16.mxu1 %v1275_v22 }
  0x23   : > { %1161 = vmatpush3.bf16.msra.mxu0 %v1288_v34  ;;  %v1295_v34 = vld [vmem:[%s1581_s5 + $0x40] sm:$0xff]  }
  0x24   : > { %1231 = vmatmul.mubr.msk.bf16.gmra.mxu0 %vm362_vm0, %v1254_v17  ;;  %1162 = vmatprep.subr.bf16.mxu0 %v1289_v35  ;;  %v1296_v35 = vld [vmem:[%s1581_s5] sm:$0xff]  }
  0x25   : > { %1234 = vmatprep.mubr.msk.bf16.mxu0 %vm362_vm0, %v1255_v18  ;;  %629 = vmatpush1.bf16.msra.mxu1 %v1277_v23 }
  0x26   : > { %630 = vmatprep.subr.bf16.mxu1 %v1278_v24 }
  0x27   : > { %1163 = vmatpush3.bf16.msra.mxu0 %v1290_v36  ;;  %v526_v36 = vlaneseq }
  0x28   : > { %1164 = vmatprep.subr.bf16.mxu0 %v1291_v31 }
  0x29   : > { %631 = vmatpush1.bf16.msra.mxu1 %v1280_v25 }
  0x2b   : > { %1165 = vmatpush3.bf16.msra.mxu0 %v1292_v32 }
  0x2c   : > { %1235 = vmatmul.mubr.msk.bf16.gmra.mxu0 %vm362_vm0, %v1256_v19  ;;  %1166 = vmatprep.subr.bf16.mxu0 %v1293_v33 }
  0xd4   : > { %v1224_v37 = vpop.f32.mrf.mxu0 }
  0xd5   : > { %v430_v51 = vadd.f32 %v1224_v37, %v1090_v39  ;;  %v527_v37 = vshrl.u32 %v526_v36, 7 }
  0xd6   : > { %v421_v38 = vpop.f32.mrf.mxu0 }
  0xd7   : > { %v422_v41 = vadd.f32 %v1090_v39, %v421_v38  ;;  %v486_v54 = vmax.f32 %v430_v51, 0.0  ;;  %v532_v38 = vsub.s32 1, %v527_v37 }
  0xd8   : > { %v1225_v40 = vpop.f32.mrf.mxu0 }
  0xd9   : > { %v484_v45 = vmax.f32 %v422_v41, 0.0  ;;  %v433_v48 = vadd.f32 %v1225_v40, %v1090_v39  ;;  %v524_v40 = vld [vmem:[%s1580_s4] sm:$0x3] }
  0xda   : > { %v424_v42 = vpop.f32.mrf.mxu0 }
  0xdb   : > { %v425_v43 = vadd.f32 %v1090_v39, %v424_v42  ;;  %v487_v52 = vmax.f32 %v433_v48, 0.0  ;;  %v1494_v42 = vrot.slane %v524_v40, %v532_v38 }
  0xdc   : > { %v1228_v44 = vpop.f32.mrf.mxu0 }
  0xdd   : > { %v485_v46 = vmax.f32 %v425_v43, 0.0  ;;  %v501_v55 = vpack.c.bf16 %v487_v52, %v486_v54  ;;  %v446_v62 = vadd.f32 %v1228_v44, %v1090_v39 }
  0xde   : > { %v437_v47 = vpop.f32.mrf.mxu0 }
  0xdf   : > { %v500_v49 = vpack.c.bf16 %v485_v46, %v484_v45  ;;  %v438_v56 = vadd.f32 %v1090_v39, %v437_v47  ;;  %v490_v2 = vmax.f32 %v446_v62, 0.0 }
  0xe0   : > { %v1229_v50 = vpop.f32.mrf.mxu0 }
  0xe1   : > { %649 = vmatmul.mubr.bf16.vlgmr.msra.gmra.mxu1 %v500_v49  ;;  %v488_v59 = vmax.f32 %v438_v56, 0.0  ;;  %v449_v63 = vadd.f32 %v1229_v50, %v1090_v39 }
  0xe2   : > { %658 = vmatprep.mubr.bf16.mxu1 %v1305_v26  ;;  %v440_v53 = vpop.f32.mrf.mxu0 }
  0xe3   : > { %v441_v57 = vadd.f32 %v1090_v39, %v440_v53  ;;  %v491_v3 = vmax.f32 %v449_v63, 0.0 }
  0xe4   : > { %v1232_v58 = vpop.f32.mrf.mxu0 }
  0xe5   : > { %v489_v60 = vmax.f32 %v441_v57, 0.0  ;;  %v503_v5 = vpack.c.bf16 %v491_v3, %v490_v2  ;;  %v462_v12 = vadd.f32 %v1232_v58, %v1090_v39 }
  0xe6   : > { %v453_v61 = vpop.f32.mrf.mxu0 }
  0xe7   : > { %v502_v0 = vpack.c.bf16 %v489_v60, %v488_v59  ;;  %v454_v6 = vadd.f32 %v1090_v39, %v453_v61  ;;  %v494_v16 = vmax.f32 %v462_v12, 0.0 }
  0xe8   : > { %v1233_v1 = vpop.f32.mrf.mxu0 }
  0xe9   : > { %659 = vmatmul.mubr.bf16.gmra.mxu1 %v501_v55  ;;  %v492_v9 = vmax.f32 %v454_v6, 0.0  ;;  %v465_v13 = vadd.f32 %v1233_v1, %v1090_v39 }
  0xea   : > { %668 = vmatprep.mubr.bf16.mxu1 %v1305_v26  ;;  %v456_v4 = vpop.f32.mrf.mxu0 }
  0xeb   : > { %v457_v7 = vadd.f32 %v1090_v39, %v456_v4  ;;  %v495_v17 = vmax.f32 %v465_v13, 0.0 }
  0xec   : > { %v1236_v8 = vpop.f32.mrf.mxu0 }
  0xed   : > { %v493_v10 = vmax.f32 %v457_v7, 0.0  ;;  %v505_v19 = vpack.c.bf16 %v495_v17, %v494_v16  ;;  %v478_v24 = vadd.f32 %v1236_v8, %v1090_v39 }
  0xee   : > { %v469_v11 = vpop.f32.mrf.mxu0 }
  0xef   : > { %v504_v14 = vpack.c.bf16 %v493_v10, %v492_v9  ;;  %v470_v20 = vadd.f32 %v1090_v39, %v469_v11  ;;  %v498_v28 = vmax.f32 %v478_v24, 0.0 }
  0xf0   : > { %v1237_v15 = vpop.f32.mrf.mxu0 }
  0xf1   : > { %669 = vmatmul.mubr.bf16.gmra.mxu1 %v502_v0  ;;  %v496_v22 = vmax.f32 %v470_v20, 0.0  ;;  %v481_v25 = vadd.f32 %v1237_v15, %v1090_v39 }
  0xf2   : > { %678 = vmatprep.mubr.bf16.mxu1 %v1305_v26  ;;  %v472_v18 = vpop.f32.mrf.mxu0 }
  0xf3   : > { %v473_v21 = vadd.f32 %v1090_v39, %v472_v18  ;;  %v499_v29 = vmax.f32 %v481_v25, 0.0  ;;  %v528_v39 = vsub.s32 0, %v527_v37 }
  0xf5   : > { %v497_v23 = vmax.f32 %v473_v21, 0.0  ;;  %v507_v30 = vpack.c.bf16 %v499_v29, %v498_v28  ;;  %v1496_v43 = vrot.slane %v524_v40, %v528_v39 }
  0xf7   : > { %v506_v27 = vpack.c.bf16 %v497_v23, %v496_v22 }
  0xf9   : > { %679 = vmatmul.mubr.bf16.gmra.mxu1 %v503_v5 }
  0xfa   : > { %688 = vmatprep.mubr.bf16.mxu1 %v1305_v26 }
 0x101   : > { %689 = vmatmul.mubr.bf16.gmra.mxu1 %v504_v14 }
 0x102   : > { %698 = vmatprep.mubr.bf16.mxu1 %v1305_v26 }
 0x109   : > { %699 = vmatmul.mubr.bf16.gmra.mxu1 %v505_v19 }
 0x10a   : > { %708 = vmatprep.mubr.bf16.mxu1 %v1305_v26 }
 0x111   : > { %709 = vmatmul.mubr.bf16.gmra.mxu1 %v506_v27 }
 0x112   : > { %718 = vmatprep.mubr.bf16.mxu1 %v1305_v26  ;;  %v1294_v26 = vld [vmem:[%s1581_s5 + $0x8] sm:$0xff]  }
 0x113   : > { %1167 = vmatpush3.bf16.msra.mxu0 %v1294_v26 }
 0x114   : > { %1168 = vmatprep.subr.bf16.mxu0 %v1295_v34 }
 0x117   : > { %1169 = vmatpush3.bf16.msra.mxu0 %v1296_v35 }
 0x119   : > { %719 = vmatmul.mubr.bf16.gmra.mxu1 %v507_v30 }
 0x1a1   : > { %v650_v41 = vpop.f32.mrf.mxu1 }
 0x1a2   : > { %v651_v48 = vadd.f32 %v650_v41, %v1496_v43 }
 0x1a3   : > { %v652_v44 = vpop.f32.mrf.mxu1 }
 0x1a4   : > { %v653_v46 = vadd.f32 %v652_v44, %v1494_v42  ;;  %v729_v55 = vmax.f32 %v651_v48, 0.0 }
 0x1a5   : > { %v654_v45 = vpop.f32.mrf.mxu1 }
 0x1a6   : > { %v655_v47 = vadd.f32 %v654_v45, %v1496_v43  ;;  %v730_v53 = vmax.f32 %v653_v46, 0.0 }
 0x1a7   : > { %v656_v49 = vpop.f32.mrf.mxu1 }
 0x1a8   : > { %v657_v50 = vadd.f32 %v656_v49, %v1494_v42  ;;  %v731_v51 = vmax.f32 %v655_v47, 0.0 }
 0x1a9   : > { %v660_v52 = vpop.f32.mrf.mxu1 }
 0x1aa   : > { %v732_v54 = vmax.f32 %v657_v50, 0.0  ;;  %v761_v58 = vpack.c.bf16 %v731_v51, %v729_v55  ;;  %v661_v62 = vadd.f32 %v660_v52, %v1496_v43 }
 0x1ab   : > { %v662_v56 = vpop.f32.mrf.mxu1 }
 0x1ac   : > { %v762_v57 = vpack.c.bf16 %v732_v54, %v730_v53  ;;  %v663_v60 = vadd.f32 %v662_v56, %v1494_v42  ;;  %v733_v5 = vmax.f32 %v661_v62, 0.0 }
 0x1ad   : > { %v664_v59 = vpop.f32.mrf.mxu1 }
 0x1ae   : > { %v665_v61 = vadd.f32 %v664_v59, %v1496_v43  ;;  %944 = vmatprep.mubr.bf16.mxu0 %v762_v57  ;;  %v734_v3 = vmax.f32 %v663_v60, 0.0 }
 0x1af   : > { %v666_v63 = vpop.f32.mrf.mxu1  ;;  %945 = vmatmul.mubr.bf16.vlgmr.msra.gmra.mxu0 %v761_v58 }
 0x1b0   : > { %v667_v0 = vadd.f32 %v666_v63, %v1494_v42  ;;  %v735_v1 = vmax.f32 %v665_v61, 0.0 }
 0x1b1   : > { %v670_v2 = vpop.f32.mrf.mxu1 }
 0x1b2   : > { %v736_v4 = vmax.f32 %v667_v0, 0.0  ;;  %v763_v8 = vpack.c.bf16 %v735_v1, %v733_v5  ;;  %v671_v12 = vadd.f32 %v670_v2, %v1496_v43 }
 0x1b3   : > { %v672_v6 = vpop.f32.mrf.mxu1 }
 0x1b4   : > { %v764_v7 = vpack.c.bf16 %v736_v4, %v734_v3  ;;  %v673_v10 = vadd.f32 %v672_v6, %v1494_v42  ;;  %v737_v19 = vmax.f32 %v671_v12, 0.0 }
 0x1b5   : > { %v674_v9 = vpop.f32.mrf.mxu1 }
 0x1b6   : > { %v675_v11 = vadd.f32 %v674_v9, %v1496_v43  ;;  %952 = vmatprep.mubr.bf16.mxu0 %v764_v7  ;;  %v738_v17 = vmax.f32 %v673_v10, 0.0 }
 0x1b7   : > { %v676_v13 = vpop.f32.mrf.mxu1  ;;  %953 = vmatmul.mubr.bf16.gmra.mxu0 %v763_v8 }
 0x1b8   : > { %v677_v14 = vadd.f32 %v676_v13, %v1494_v42  ;;  %v739_v15 = vmax.f32 %v675_v11, 0.0 }
 0x1b9   : > { %v680_v16 = vpop.f32.mrf.mxu1 }
 0x1ba   : > { %v740_v18 = vmax.f32 %v677_v14, 0.0  ;;  %v765_v22 = vpack.c.bf16 %v739_v15, %v737_v19  ;;  %v681_v27 = vadd.f32 %v680_v16, %v1496_v43 }
 0x1bb   : > { %v682_v20 = vpop.f32.mrf.mxu1 }
 0x1bc   : > { %v766_v21 = vpack.c.bf16 %v740_v18, %v738_v17  ;;  %v683_v24 = vadd.f32 %v682_v20, %v1494_v42  ;;  %v741_v26 = vmax.f32 %v681_v27, 0.0 }
 0x1bd   : > { %v684_v23 = vpop.f32.mrf.mxu1 }
 0x1be   : > { %v685_v25 = vadd.f32 %v684_v23, %v1496_v43  ;;  %960 = vmatprep.mubr.bf16.mxu0 %v766_v21  ;;  %v742_v32 = vmax.f32 %v683_v24, 0.0 }
 0x1bf   : > { %v686_v28 = vpop.f32.mrf.mxu1  ;;  %961 = vmatmul.mubr.bf16.gmra.mxu0 %v765_v22 }
 0x1c0   : > { %v687_v29 = vadd.f32 %v686_v28, %v1494_v42  ;;  %v743_v30 = vmax.f32 %v685_v25, 0.0 }
 0x1c1   : > { %v690_v31 = vpop.f32.mrf.mxu1 }
 0x1c2   : > { %v744_v33 = vmax.f32 %v687_v29, 0.0  ;;  %v767_v36 = vpack.c.bf16 %v743_v30, %v741_v26  ;;  %v691_v40 = vadd.f32 %v690_v31, %v1496_v43  ;;  %v1534_v31 = vld [vmem:[%s1582_s6] ss:$0 sm:$0xff] }
 0x1c3   : > { %v692_v34 = vpop.f32.mrf.mxu1 }
 0x1c4   : > { %v768_v35 = vpack.c.bf16 %v744_v33, %v742_v32  ;;  %v693_v38 = vadd.f32 %v692_v34, %v1494_v42  ;;  %v745_v49 = vmax.f32 %v691_v40, 0.0 }
 0x1c5   : > { %v694_v37 = vpop.f32.mrf.mxu1 }
 0x1c6   : > { %v695_v39 = vadd.f32 %v694_v37, %v1496_v43  ;;  %968 = vmatprep.mubr.bf16.mxu0 %v768_v35  ;;  %v746_v47 = vmax.f32 %v693_v38, 0.0 }
 0x1c7   : > { %v696_v41 = vpop.f32.mrf.mxu1  ;;  %969 = vmatmul.mubr.bf16.gmra.mxu0 %v767_v36 }
 0x1c8   : > { %v697_v44 = vadd.f32 %v696_v41, %v1494_v42  ;;  %v747_v45 = vmax.f32 %v695_v39, 0.0 }
 0x1c9   : > { %v700_v46 = vpop.f32.mrf.mxu1 }
 0x1ca   : > { %v748_v48 = vmax.f32 %v697_v44, 0.0  ;;  %v769_v52 = vpack.c.bf16 %v747_v45, %v745_v49  ;;  %v701_v56 = vadd.f32 %v700_v46, %v1496_v43 }
 0x1cb   : > { %v702_v50 = vpop.f32.mrf.mxu1 }
 0x1cc   : > { %v770_v51 = vpack.c.bf16 %v748_v48, %v746_v47  ;;  %v703_v54 = vadd.f32 %v702_v50, %v1494_v42  ;;  %v749_v63 = vmax.f32 %v701_v56, 0.0 }
 0x1cd   : > { %v704_v53 = vpop.f32.mrf.mxu1 }
 0x1ce   : > { %v705_v55 = vadd.f32 %v704_v53, %v1496_v43  ;;  %976 = vmatprep.mubr.bf16.mxu0 %v770_v51  ;;  %v750_v61 = vmax.f32 %v703_v54, 0.0 }
 0x1cf   : > { %v706_v57 = vpop.f32.mrf.mxu1  ;;  %977 = vmatmul.mubr.bf16.gmra.mxu0 %v769_v52 }
 0x1d0   : > { %v707_v58 = vadd.f32 %v706_v57, %v1494_v42  ;;  %v751_v59 = vmax.f32 %v705_v55, 0.0 }
 0x1d1   : > { %v710_v60 = vpop.f32.mrf.mxu1 }
 0x1d2   : > { %v752_v62 = vmax.f32 %v707_v58, 0.0  ;;  %v771_v2 = vpack.c.bf16 %v751_v59, %v749_v63  ;;  %v711_v6 = vadd.f32 %v710_v60, %v1496_v43 }
 0x1d3   : > { %v712_v0 = vpop.f32.mrf.mxu1 }
 0x1d4   : > { %v772_v1 = vpack.c.bf16 %v752_v62, %v750_v61  ;;  %v713_v4 = vadd.f32 %v712_v0, %v1494_v42  ;;  %v753_v13 = vmax.f32 %v711_v6, 0.0 }
 0x1d5   : > { %v714_v3 = vpop.f32.mrf.mxu1 }
 0x1d6   : > { %v715_v5 = vadd.f32 %v714_v3, %v1496_v43  ;;  %984 = vmatprep.mubr.bf16.mxu0 %v772_v1  ;;  %v754_v11 = vmax.f32 %v713_v4, 0.0 }
 0x1d7   : > { %v716_v7 = vpop.f32.mrf.mxu1  ;;  %985 = vmatmul.mubr.bf16.gmra.mxu0 %v771_v2 }
 0x1d8   : > { %v717_v8 = vadd.f32 %v716_v7, %v1494_v42  ;;  %v755_v9 = vmax.f32 %v715_v5, 0.0 }
 0x1d9   : > { %v720_v10 = vpop.f32.mrf.mxu1 }
 0x1da   : > { %v756_v12 = vmax.f32 %v717_v8, 0.0  ;;  %v773_v16 = vpack.c.bf16 %v755_v9, %v753_v13  ;;  %v721_v20 = vadd.f32 %v720_v10, %v1496_v43 }
 0x1db   : > { %v722_v14 = vpop.f32.mrf.mxu1 }
 0x1dc   : > { %v774_v15 = vpack.c.bf16 %v756_v12, %v754_v11  ;;  %v723_v18 = vadd.f32 %v722_v14, %v1494_v42  ;;  %v757_v27 = vmax.f32 %v721_v20, 0.0 }
 0x1dd   : > { %v724_v17 = vpop.f32.mrf.mxu1 }
 0x1de   : > { %v725_v19 = vadd.f32 %v724_v17, %v1496_v43  ;;  %992 = vmatprep.mubr.bf16.mxu0 %v774_v15  ;;  %v758_v24 = vmax.f32 %v723_v18, 0.0 }
 0x1df   : > { %v726_v21 = vpop.f32.mrf.mxu1  ;;  %993 = vmatmul.mubr.bf16.gmra.mxu0 %v773_v16 }
 0x1e0   : > { %v727_v22 = vadd.f32 %v726_v21, %v1494_v42  ;;  %v759_v23 = vmax.f32 %v725_v19, 0.0 }
 0x1e2   : > { %v760_v25 = vmax.f32 %v727_v22, 0.0  ;;  %v775_v29 = vpack.c.bf16 %v759_v23, %v757_v27 }
 0x1e4   : > { %v776_v28 = vpack.c.bf16 %v760_v25, %v758_v24 }
 0x1e6   : > { %1000 = vmatprep.mubr.bf16.mxu0 %v776_v28 }
 0x1e7   : > { %1001 = vmatmul.mubr.bf16.gmra.mxu0 %v775_v29 }
 0x26f   : > { %v1170_v30 = vpop.f32.mrf.mxu0 }
 0x271   : > { %v1171_v43 = vpop.f32.mrf.mxu0 }
 0x272   : > { %v1172_v32 = vadd.f32 %v1171_v43, %v1170_v30 }
 0x273   : > { %v1173_v42 = vpop.f32.mrf.mxu0 }
 0x274   : > { %v947_v33 = vadd.f32 %v1172_v32, %v1534_v31 }
 0x275   : > { %v1174_v26 = vpop.f32.mrf.mxu0 }
 0x276   : > { %1009 = vst [vmem:[%s1539_s22] sm:$0xff] %v947_v33  ;;  %v1175_v34 = vadd.f32 %v1174_v26, %v1173_v42 }
 0x277   : > { %v1176_v35 = vpop.f32.mrf.mxu0 }
 0x278   : > { %v950_v36 = vadd.f32 %v1175_v34, %v1534_v31 }
 0x279   : > { %v1177_v37 = vpop.f32.mrf.mxu0 }
 0x27a   : > { %1010 = vst [vmem:[%s1539_s22 + $0x8] sm:$0xff] %v950_v36  ;;  %v1178_v38 = vadd.f32 %v1177_v37, %v1176_v35 }
 0x27b   : > { %v1179_v39 = vpop.f32.mrf.mxu0 }
 0x27c   : > { %v955_v40 = vadd.f32 %v1178_v38, %v1534_v31 }
 0x27d   : > { %v1180_v41 = vpop.f32.mrf.mxu0 }
 0x27e   : > { %1011 = vst [vmem:[%s1539_s22 + $0x10] sm:$0xff] %v955_v40  ;;  %v1181_v44 = vadd.f32 %v1180_v41, %v1179_v39 }
 0x27f   : > { %v1182_v45 = vpop.f32.mrf.mxu0 }
 0x280   : > { %v958_v46 = vadd.f32 %v1181_v44, %v1534_v31 }
 0x281   : > { %v1183_v47 = vpop.f32.mrf.mxu0 }
 0x282   : > { %1012 = vst [vmem:[%s1539_s22 + $0x18] sm:$0xff] %v958_v46  ;;  %v1184_v48 = vadd.f32 %v1183_v47, %v1182_v45 }
 0x283   : > { %v1185_v49 = vpop.f32.mrf.mxu0 }
 0x284   : > { %v963_v50 = vadd.f32 %v1184_v48, %v1534_v31 }
 0x285   : > { %v1186_v51 = vpop.f32.mrf.mxu0 }
 0x286   : > { %1013 = vst [vmem:[%s1539_s22 + $0x20] sm:$0xff] %v963_v50  ;;  %v1187_v52 = vadd.f32 %v1186_v51, %v1185_v49 }
 0x287   : > { %v1188_v53 = vpop.f32.mrf.mxu0 }
 0x288   : > { %v966_v54 = vadd.f32 %v1187_v52, %v1534_v31 }
 0x289   : > { %v1189_v55 = vpop.f32.mrf.mxu0 }
 0x28a   : > { %1014 = vst [vmem:[%s1539_s22 + $0x28] sm:$0xff] %v966_v54  ;;  %v1190_v56 = vadd.f32 %v1189_v55, %v1188_v53 }
 0x28b   : > { %v1191_v57 = vpop.f32.mrf.mxu0 }
 0x28c   : > { %v971_v58 = vadd.f32 %v1190_v56, %v1534_v31 }
 0x28d   : > { %v1192_v59 = vpop.f32.mrf.mxu0 }
 0x28e   : > { %1015 = vst [vmem:[%s1539_s22 + $0x30] sm:$0xff] %v971_v58  ;;  %v1193_v60 = vadd.f32 %v1192_v59, %v1191_v57 }
 0x28f   : > { %v1194_v61 = vpop.f32.mrf.mxu0 }
 0x290   : > { %v974_v62 = vadd.f32 %v1193_v60, %v1534_v31 }
 0x291   : > { %v1195_v63 = vpop.f32.mrf.mxu0 }
 0x292   : > { %1016 = vst [vmem:[%s1539_s22 + $0x38] sm:$0xff] %v974_v62  ;;  %v1196_v0 = vadd.f32 %v1195_v63, %v1194_v61 }
 0x293   : > { %v1197_v1 = vpop.f32.mrf.mxu0 }
 0x294   : > { %v979_v2 = vadd.f32 %v1196_v0, %v1534_v31 }
 0x295   : > { %v1198_v3 = vpop.f32.mrf.mxu0 }
 0x296   : > { %1017 = vst [vmem:[%s1539_s22 + $0x40] sm:$0xff] %v979_v2  ;;  %v1199_v4 = vadd.f32 %v1198_v3, %v1197_v1 }
 0x297   : > { %v1200_v5 = vpop.f32.mrf.mxu0 }
 0x298   : > { %v982_v6 = vadd.f32 %v1199_v4, %v1534_v31 }
 0x299   : > { %v1201_v7 = vpop.f32.mrf.mxu0 }
 0x29a   : > { %1018 = vst [vmem:[%s1539_s22 + $0x48] sm:$0xff] %v982_v6  ;;  %v1202_v8 = vadd.f32 %v1201_v7, %v1200_v5 }
 0x29b   : > { %v1203_v9 = vpop.f32.mrf.mxu0 }
 0x29c   : > { %v987_v10 = vadd.f32 %v1202_v8, %v1534_v31 }
 0x29d   : > { %v1204_v11 = vpop.f32.mrf.mxu0 }
 0x29e   : > { %1019 = vst [vmem:[%s1539_s22 + $0x50] sm:$0xff] %v987_v10  ;;  %v1205_v12 = vadd.f32 %v1204_v11, %v1203_v9 }
 0x29f   : > { %v1206_v13 = vpop.f32.mrf.mxu0 }
 0x2a0   : > { %v990_v14 = vadd.f32 %v1205_v12, %v1534_v31 }
 0x2a1   : > { %v1207_v15 = vpop.f32.mrf.mxu0 }
 0x2a2   : > { %1020 = vst [vmem:[%s1539_s22 + $0x58] sm:$0xff] %v990_v14  ;;  %v1208_v16 = vadd.f32 %v1207_v15, %v1206_v13 }
 0x2a3   : > { %v1209_v17 = vpop.f32.mrf.mxu0 }
 0x2a4   : > { %v995_v18 = vadd.f32 %v1208_v16, %v1534_v31 }
 0x2a5   : > { %v1210_v19 = vpop.f32.mrf.mxu0 }
 0x2a6   : > { %1021 = vst [vmem:[%s1539_s22 + $0x60] sm:$0xff] %v995_v18  ;;  %v1211_v20 = vadd.f32 %v1210_v19, %v1209_v17 }
 0x2a7   : > { %v1212_v21 = vpop.f32.mrf.mxu0 }
 0x2a8   : > { %v998_v22 = vadd.f32 %v1211_v20, %v1534_v31 }
 0x2a9   : > { %v1213_v23 = vpop.f32.mrf.mxu0 }
 0x2aa   : > { %1022 = vst [vmem:[%s1539_s22 + $0x68] sm:$0xff] %v998_v22  ;;  %v1214_v24 = vadd.f32 %v1213_v23, %v1212_v21 }
 0x2ab   : > { %v1215_v25 = vpop.f32.mrf.mxu0 }
 0x2ac   : > { %v1003_v27 = vadd.f32 %v1214_v24, %v1534_v31 }
 0x2ad   : > { %v1216_v28 = vpop.f32.mrf.mxu0 }
 0x2ae   : > { %1023 = vst [vmem:[%s1539_s22 + $0x70] sm:$0xff] %v1003_v27  ;;  %v1217_v29 = vadd.f32 %v1216_v28, %v1215_v25 }
 0x2b0   : > { %v1006_v30 = vadd.f32 %v1217_v29, %v1534_v31 }
 0x2b2   : > { %1024 = vst [vmem:[%s1539_s22 + $0x78] sm:$0xff] %v1006_v30 }
 0x2b3 PF: > { %s17_s24 = sadd.s32 1, %s1303_s24  }
 0x2b4   : > { %p14_p4 = scmp.ge.s32.totalorder %s17_s24, 4  }
 0x2b6   :  { %16 = sbr.rel (!%p14_p4) target bundleno = 1 (0x1), region = 78 }

// kernel: bc_model_forward.1
= control target key start
LH: loop header
LB: loop body
LE: loop exit
PB: predicated region body
PF: predicated region fallthrough
CT: control target
= control target key end

     0   :  { %s1346_s24 = smov 0   ;;  %s1576_s0 = inlined_call_operand.vmem [shape: bf16[256,32], index: 0, kind: input, shape index: {}]   ;;  %s1577_s1 = inlined_call_operand.vmem [shape: bf16[32,128], index: 1, kind: input, shape index: {}]   ;;  %s1578_s2 = inlined_call_operand.vmem [shape: f32[1,128], index: 2, kind: input, shape index: {}]   ;;  %s1579_s3 = inlined_call_operand.vmem [shape: bf16[128,256], index: 3, kind: input, shape index: {}]   ;;  %s1580_s4 = inlined_call_operand.vmem [shape: f32[1,256], index: 4, kind: input, shape index: {}]   ;;  %s1581_s5 = inlined_call_operand.vmem [shape: bf16[256,128], index: 5, kind: input, shape index: {}]   ;;  %s1582_s6 = inlined_call_operand.vmem [shape: f32[1,128], index: 6, kind: input, shape index: {}]   ;;  %s1583_s7 = inlined_call_operand.vmem [shape: f32[256,128], index: 7, kind: output, shape index: {}]  }
   0x1 LB: > { %s1081_s25 = sadd.s32 4294967295, %s1303_s24   ;;  %p1085_p0 = scmp.ge.s32.totalorder %s1303_s24, 1  ;;  %s1303_s24 = sphi %s1346_s24, %s17_s24  }
   0x2   : > { %p238_p1 = scmp.lt.s32.totalorder %s1303_s24, 3 }
   0x4   : > { %p239_p2 = pnand %p1085_p0, %p238_p1 }
   0x5   : > { %s1086_s28 = sshll.u32 (!%p239_p2), %s1081_s25, 4 }
   0x6   : > { %242 = sbr.rel (%p239_p2) target bundleno = 691 (0x2b3), region = 48  ;;  %p271_p3 = scmp.lt.s32.totalorder (!%p239_p2), %s1086_s28, 31 }
   0xb   : > { %v1247_v0 = vld [vmem:[%s1577_s1 + $0x8] sm:$0xff]   ;;  %v1248_v1 = vld [vmem:[%s1577_s1] sm:$0xff]   ;;  %v1257_v2 = vld [vmem:[%s1579_s3 + $0x74] ss:$8 sps:$4 sm:$0xff]   ;;  %s1585_s28 = smov (!%p271_p3, %s1086_s28), 31  ;;  %vm362_vm0 = vcmask 261120  }
   0xc   : > { %1218 = vmatprep.subr.bf16.mxu0 %v1247_v0  ;;  %v1259_v3 = vld [vmem:[%s1579_s3 + $0x70] ss:$8 sps:$4 sm:$0xff]   ;;  %616 = vmatprep.subr.bf16.mxu1 %v1257_v2  ;;  %v1260_v4 = vld [vmem:[%s1579_s3 + $0x64] ss:$8 sps:$4 sm:$0xff]   ;;  %s1087_s14 = sshll.u32 %s1585_s28, 2  ;;  %v1305_v26 = vmov 0  }
   0xd   : > { %1219 = vmatpush3.bf16.msra.mxu0 %v1247_v0  ;;  %617 = vmatpush1.bf16.msra.mxu1 %v1259_v3  ;;  %v1262_v5 = vld [vmem:[%s1579_s3 + $0x60] ss:$8 sps:$4 sm:$0xff]   ;;  %s1378_s19 = scalar_lea.vmem %s1576_s0, %s1087_s14  ;;  %v1263_v6 = vld [vmem:[%s1579_s3 + $0x54] ss:$8 sps:$4 sm:$0xff]   ;;  %v1265_v8 = vld [vmem:[%s1579_s3 + $0x50] ss:$8 sps:$4 sm:$0xff]  }
   0xe   : > { %1220 = vmatprep.subr.bf16.mxu0 %v1248_v1  ;;  %618 = vmatprep.subr.bf16.mxu1 %v1260_v4  ;;  %v1249_v7 = vld [vmem:[%s1378_s19] sm:$0xff]   ;;  %v1250_v9 = vld [vmem:[%s1378_s19 + $0x8] sm:$0xff]   ;;  %v1251_v10 = vld [vmem:[%s1378_s19 + $0x10] sm:$0xff]   ;;  %s1089_s17 = sshll.u32 %s1585_s28, 3 }
   0xf   : > { %1222 = vmatprep.mubr.msk.bf16.mxu0 %vm362_vm0, %v1249_v7  ;;  %v1266_v11 = vld [vmem:[%s1579_s3 + $0x44] ss:$8 sps:$4 sm:$0xff]   ;;  %v1252_v12 = vld [vmem:[%s1378_s19 + $0x18] sm:$0xff]   ;;  %v1268_v14 = vld [vmem:[%s1579_s3 + $0x40] ss:$8 sps:$4 sm:$0xff]   ;;  %648 = vmatprep.mubr.bf16.mxu1 %v1305_v26  ;;  %s1539_s22 = scalar_lea.vmem %s1583_s7, %s1089_s17 }
  0x10   : > { %v1253_v13 = vld [vmem:[%s1378_s19 + $0x20] sm:$0xff]   ;;  %v1269_v15 = vld [vmem:[%s1579_s3 + $0x34] ss:$8 sps:$4 sm:$0xff]   ;;  %v1271_v16 = vld [vmem:[%s1579_s3 + $0x30] ss:$8 sps:$4 sm:$0xff]  }
  0x11   : > { %1221 = vmatpush3.bf16.msra.mxu0 %v1248_v1  ;;  %619 = vmatpush1.bf16.msra.mxu1 %v1262_v5  ;;  %v1254_v17 = vld [vmem:[%s1378_s19 + $0x28] sm:$0xff]   ;;  %v1255_v18 = vld [vmem:[%s1378_s19 + $0x30] sm:$0xff]   ;;  %v1256_v19 = vld [vmem:[%s1378_s19 + $0x38] sm:$0xff]  }
  0x12   : > { %620 = vmatprep.subr.bf16.mxu1 %v1263_v6  ;;  %v1272_v20 = vld [vmem:[%s1579_s3 + $0x24] ss:$8 sps:$4 sm:$0xff]   ;;  %v1274_v21 = vld [vmem:[%s1579_s3 + $0x20] ss:$8 sps:$4 sm:$0xff]   ;;  %v1275_v22 = vld [vmem:[%s1579_s3 + $0x14] ss:$8 sps:$4 sm:$0xff]  }
  0x13   : > { %v1277_v23 = vld [vmem:[%s1579_s3 + $0x10] ss:$8 sps:$4 sm:$0xff]   ;;  %v1278_v24 = vld [vmem:[%s1579_s3 + $0x4] ss:$8 sps:$4 sm:$0xff]   ;;  %v1280_v25 = vld [vmem:[%s1579_s3] ss:$8 sps:$4 sm:$0xff]  }
  0x14   : > { %1223 = vmatmul.mubr.msk.bf16.vlgmr.msra.gmra.mxu0 %vm362_vm0, %v1250_v9  ;;  %v1281_v27 = vld [vmem:[%s1581_s5 + $0x78] sm:$0xff]   ;;  %v1283_v29 = vld [vmem:[%s1581_s5 + $0x70] sm:$0xff]   ;;  %v1285_v31 = vld [vmem:[%s1581_s5 + $0x68] sm:$0xff]  }
  0x15   : > { %1226 = vmatprep.mubr.msk.bf16.mxu0 %vm362_vm0, %v1251_v10  ;;  %621 = vmatpush1.bf16.msra.mxu1 %v1265_v8  ;;  %v1282_v28 = vld [vmem:[%s1581_s5 + $0x38] sm:$0xff]   ;;  %v1284_v30 = vld [vmem:[%s1581_s5 + $0x30] sm:$0xff]   ;;  %v1286_v32 = vld [vmem:[%s1581_s5 + $0x28] sm:$0xff]  }
  0x16   : > { %622 = vmatprep.subr.bf16.mxu1 %v1266_v11  ;;  %1154 = vmatprep.subr.bf16.mxu0 %v1281_v27  ;;  %v1287_v33 = vld [vmem:[%s1581_s5 + $0x60] sm:$0xff]   ;;  %v1289_v35 = vld [vmem:[%s1581_s5 + $0x58] sm:$0xff]  }
  0x17   : > { %1155 = vmatpush3.bf16.msra.mxu0 %v1282_v28  ;;  %v1288_v34 = vld [vmem:[%s1581_s5 + $0x20] sm:$0xff]   ;;  %v1290_v36 = vld [vmem:[%s1581_s5 + $0x18] sm:$0xff]  }
  0x18   : > { %1156 = vmatprep.subr.bf16.mxu0 %v1283_v29  ;;  %v1090_v39 = vld [vmem:[%s1578_s2] ss:$0 sm:$0xff] }
  0x19   : > { %623 = vmatpush1.bf16.msra.mxu1 %v1268_v14 }
  0x1a   : > { %624 = vmatprep.subr.bf16.mxu1 %v1269_v15 }
  0x1b   : > { %1157 = vmatpush3.bf16.msra.mxu0 %v1284_v30 }
  0x1c   : > { %1227 = vmatmul.mubr.msk.bf16.gmra.mxu0 %vm362_vm0, %v1252_v12  ;;  %1158 = vmatprep.subr.bf16.mxu0 %v1285_v31  ;;  %v1291_v31 = vld [vmem:[%s1581_s5 + $0x50] sm:$0xff]  }
  0x1d   : > { %1230 = vmatprep.mubr.msk.bf16.mxu0 %vm362_vm0, %v1253_v13  ;;  %625 = vmatpush1.bf16.msra.mxu1 %v1271_v16 }
  0x1e   : > { %626 = vmatprep.subr.bf16.mxu1 %v1272_v20 }
  0x1f   : > { %1159 = vmatpush3.bf16.msra.mxu0 %v1286_v32  ;;  %v1292_v32 = vld [vmem:[%s1581_s5 + $0x10] sm:$0xff]  }
  0x20   : > { %1160 = vmatprep.subr.bf16.mxu0 %v1287_v33  ;;  %v1293_v33 = vld [vmem:[%s1581_s5 + $0x48] sm:$0xff]  }
  0x21   : > { %627 = vmatpush1.bf16.msra.mxu1 %v1274_v21 }
  0x22   : > { %628 = vmatprep.subr.bf16.mxu1 %v1275_v22 }
  0x23   : > { %1161 = vmatpush3.bf16.msra.mxu0 %v1288_v34  ;;  %v1295_v34 = vld [vmem:[%s1581_s5 + $0x40] sm:$0xff]  }
  0x24   : > { %1231 = vmatmul.mubr.msk.bf16.gmra.mxu0 %vm362_vm0, %v1254_v17  ;;  %1162 = vmatprep.subr.bf16.mxu0 %v1289_v35  ;;  %v1296_v35 = vld [vmem:[%s1581_s5] sm:$0xff]  }
  0x25   : > { %1234 = vmatprep.mubr.msk.bf16.mxu0 %vm362_vm0, %v1255_v18  ;;  %629 = vmatpush1.bf16.msra.mxu1 %v1277_v23 }
  0x26   : > { %630 = vmatprep.subr.bf16.mxu1 %v1278_v24 }
  0x27   : > { %1163 = vmatpush3.bf16.msra.mxu0 %v1290_v36  ;;  %v526_v36 = vlaneseq }
  0x28   : > { %1164 = vmatprep.subr.bf16.mxu0 %v1291_v31 }
  0x29   : > { %631 = vmatpush1.bf16.msra.mxu1 %v1280_v25 }
  0x2b   : > { %1165 = vmatpush3.bf16.msra.mxu0 %v1292_v32 }
  0x2c   : > { %1235 = vmatmul.mubr.msk.bf16.gmra.mxu0 %vm362_vm0, %v1256_v19  ;;  %1166 = vmatprep.subr.bf16.mxu0 %v1293_v33 }
  0xd4   : > { %v1224_v37 = vpop.f32.mrf.mxu0 }
  0xd5   : > { %v430_v51 = vadd.f32 %v1224_v37, %v1090_v39  ;;  %v527_v37 = vshrl.u32 %v526_v36, 7 }
  0xd6   : > { %v421_v38 = vpop.f32.mrf.mxu0 }
  0xd7   : > { %v422_v41 = vadd.f32 %v1090_v39, %v421_v38  ;;  %v486_v54 = vmax.f32 %v430_v51, 0.0  ;;  %v532_v38 = vsub.s32 1, %v527_v37 }
  0xd8   : > { %v1225_v40 = vpop.f32.mrf.mxu0 }
  0xd9   : > { %v484_v45 = vmax.f32 %v422_v41, 0.0  ;;  %v433_v48 = vadd.f32 %v1225_v40, %v1090_v39  ;;  %v524_v40 = vld [vmem:[%s1580_s4] sm:$0x3] }
  0xda   : > { %v424_v42 = vpop.f32.mrf.mxu0 }
  0xdb   : > { %v425_v43 = vadd.f32 %v1090_v39, %v424_v42  ;;  %v487_v52 = vmax.f32 %v433_v48, 0.0  ;;  %v1494_v42 = vrot.slane %v524_v40, %v532_v38 }
  0xdc   : > { %v1228_v44 = vpop.f32.mrf.mxu0 }
  0xdd   : > { %v485_v46 = vmax.f32 %v425_v43, 0.0  ;;  %v501_v55 = vpack.c.bf16 %v487_v52, %v486_v54  ;;  %v446_v62 = vadd.f32 %v1228_v44, %v1090_v39 }
  0xde   : > { %v437_v47 = vpop.f32.mrf.mxu0 }
  0xdf   : > { %v500_v49 = vpack.c.bf16 %v485_v46, %v484_v45  ;;  %v438_v56 = vadd.f32 %v1090_v39, %v437_v47  ;;  %v490_v2 = vmax.f32 %v446_v62, 0.0 }
  0xe0   : > { %v1229_v50 = vpop.f32.mrf.mxu0 }
  0xe1   : > { %649 = vmatmul.mubr.bf16.vlgmr.msra.gmra.mxu1 %v500_v49  ;;  %v488_v59 = vmax.f32 %v438_v56, 0.0  ;;  %v449_v63 = vadd.f32 %v1229_v50, %v1090_v39 }
  0xe2   : > { %658 = vmatprep.mubr.bf16.mxu1 %v1305_v26  ;;  %v440_v53 = vpop.f32.mrf.mxu0 }
  0xe3   : > { %v441_v57 = vadd.f32 %v1090_v39, %v440_v53  ;;  %v491_v3 = vmax.f32 %v449_v63, 0.0 }
  0xe4   : > { %v1232_v58 = vpop.f32.mrf.mxu0 }
  0xe5   : > { %v489_v60 = vmax.f32 %v441_v57, 0.0  ;;  %v503_v5 = vpack.c.bf16 %v491_v3, %v490_v2  ;;  %v462_v12 = vadd.f32 %v1232_v58, %v1090_v39 }
  0xe6   : > { %v453_v61 = vpop.f32.mrf.mxu0 }
  0xe7   : > { %v502_v0 = vpack.c.bf16 %v489_v60, %v488_v59  ;;  %v454_v6 = vadd.f32 %v1090_v39, %v453_v61  ;;  %v494_v16 = vmax.f32 %v462_v12, 0.0 }
  0xe8   : > { %v1233_v1 = vpop.f32.mrf.mxu0 }
  0xe9   : > { %659 = vmatmul.mubr.bf16.gmra.mxu1 %v501_v55  ;;  %v492_v9 = vmax.f32 %v454_v6, 0.0  ;;  %v465_v13 = vadd.f32 %v1233_v1, %v1090_v39 }
  0xea   : > { %668 = vmatprep.mubr.bf16.mxu1 %v1305_v26  ;;  %v456_v4 = vpop.f32.mrf.mxu0 }
  0xeb   : > { %v457_v7 = vadd.f32 %v1090_v39, %v456_v4  ;;  %v495_v17 = vmax.f32 %v465_v13, 0.0 }
  0xec   : > { %v1236_v8 = vpop.f32.mrf.mxu0 }
  0xed   : > { %v493_v10 = vmax.f32 %v457_v7, 0.0  ;;  %v505_v19 = vpack.c.bf16 %v495_v17, %v494_v16  ;;  %v478_v24 = vadd.f32 %v1236_v8, %v1090_v39 }
  0xee   : > { %v469_v11 = vpop.f32.mrf.mxu0 }
  0xef   : > { %v504_v14 = vpack.c.bf16 %v493_v10, %v492_v9  ;;  %v470_v20 = vadd.f32 %v1090_v39, %v469_v11  ;;  %v498_v28 = vmax.f32 %v478_v24, 0.0 }
  0xf0   : > { %v1237_v15 = vpop.f32.mrf.mxu0 }
  0xf1   : > { %669 = vmatmul.mubr.bf16.gmra.mxu1 %v502_v0  ;;  %v496_v22 = vmax.f32 %v470_v20, 0.0  ;;  %v481_v25 = vadd.f32 %v1237_v15, %v1090_v39 }
  0xf2   : > { %678 = vmatprep.mubr.bf16.mxu1 %v1305_v26  ;;  %v472_v18 = vpop.f32.mrf.mxu0 }
  0xf3   : > { %v473_v21 = vadd.f32 %v1090_v39, %v472_v18  ;;  %v499_v29 = vmax.f32 %v481_v25, 0.0  ;;  %v528_v39 = vsub.s32 0, %v527_v37 }
  0xf5   : > { %v497_v23 = vmax.f32 %v473_v21, 0.0  ;;  %v507_v30 = vpack.c.bf16 %v499_v29, %v498_v28  ;;  %v1496_v43 = vrot.slane %v524_v40, %v528_v39 }
  0xf7   : > { %v506_v27 = vpack.c.bf16 %v497_v23, %v496_v22 }
  0xf9   : > { %679 = vmatmul.mubr.bf16.gmra.mxu1 %v503_v5 }
  0xfa   : > { %688 = vmatprep.mubr.bf16.mxu1 %v1305_v26 }
 0x101   : > { %689 = vmatmul.mubr.bf16.gmra.mxu1 %v504_v14 }
 0x102   : > { %698 = vmatprep.mubr.bf16.mxu1 %v1305_v26 }
 0x109   : > { %699 = vmatmul.mubr.bf16.gmra.mxu1 %v505_v19 }
 0x10a   : > { %708 = vmatprep.mubr.bf16.mxu1 %v1305_v26 }
 0x111   : > { %709 = vmatmul.mubr.bf16.gmra.mxu1 %v506_v27 }
 0x112   : > { %718 = vmatprep.mubr.bf16.mxu1 %v1305_v26  ;;  %v1294_v26 = vld [vmem:[%s1581_s5 + $0x8] sm:$0xff]  }
 0x113   : > { %1167 = vmatpush3.bf16.msra.mxu0 %v1294_v26 }
 0x114   : > { %1168 = vmatprep.subr.bf16.mxu0 %v1295_v34 }
 0x117   : > { %1169 = vmatpush3.bf16.msra.mxu0 %v1296_v35 }
 0x119   : > { %719 = vmatmul.mubr.bf16.gmra.mxu1 %v507_v30 }
 0x1a1   : > { %v650_v41 = vpop.f32.mrf.mxu1 }
 0x1a2   : > { %v651_v48 = vadd.f32 %v650_v41, %v1496_v43 }
 0x1a3   : > { %v652_v44 = vpop.f32.mrf.mxu1 }
 0x1a4   : > { %v653_v46 = vadd.f32 %v652_v44, %v1494_v42  ;;  %v729_v55 = vmax.f32 %v651_v48, 0.0 }
 0x1a5   : > { %v654_v45 = vpop.f32.mrf.mxu1 }
 0x1a6   : > { %v655_v47 = vadd.f32 %v654_v45, %v1496_v43  ;;  %v730_v53 = vmax.f32 %v653_v46, 0.0 }
 0x1a7   : > { %v656_v49 = vpop.f32.mrf.mxu1 }
 0x1a8   : > { %v657_v50 = vadd.f32 %v656_v49, %v1494_v42  ;;  %v731_v51 = vmax.f32 %v655_v47, 0.0 }
 0x1a9   : > { %v660_v52 = vpop.f32.mrf.mxu1 }
 0x1aa   : > { %v732_v54 = vmax.f32 %v657_v50, 0.0  ;;  %v761_v58 = vpack.c.bf16 %v731_v51, %v729_v55  ;;  %v661_v62 = vadd.f32 %v660_v52, %v1496_v43 }
 0x1ab   : > { %v662_v56 = vpop.f32.mrf.mxu1 }
 0x1ac   : > { %v762_v57 = vpack.c.bf16 %v732_v54, %v730_v53  ;;  %v663_v60 = vadd.f32 %v662_v56, %v1494_v42  ;;  %v733_v5 = vmax.f32 %v661_v62, 0.0 }
 0x1ad   : > { %v664_v59 = vpop.f32.mrf.mxu1 }
 0x1ae   : > { %v665_v61 = vadd.f32 %v664_v59, %v1496_v43  ;;  %944 = vmatprep.mubr.bf16.mxu0 %v762_v57  ;;  %v734_v3 = vmax.f32 %v663_v60, 0.0 }
 0x1af   : > { %v666_v63 = vpop.f32.mrf.mxu1  ;;  %945 = vmatmul.mubr.bf16.vlgmr.msra.gmra.mxu0 %v761_v58 }
 0x1b0   : > { %v667_v0 = vadd.f32 %v666_v63, %v1494_v42  ;;  %v735_v1 = vmax.f32 %v665_v61, 0.0 }
 0x1b1   : > { %v670_v2 = vpop.f32.mrf.mxu1 }
 0x1b2   : > { %v736_v4 = vmax.f32 %v667_v0, 0.0  ;;  %v763_v8 = vpack.c.bf16 %v735_v1, %v733_v5  ;;  %v671_v12 = vadd.f32 %v670_v2, %v1496_v43 }
 0x1b3   : > { %v672_v6 = vpop.f32.mrf.mxu1 }
 0x1b4   : > { %v764_v7 = vpack.c.bf16 %v736_v4, %v734_v3  ;;  %v673_v10 = vadd.f32 %v672_v6, %v1494_v42  ;;  %v737_v19 = vmax.f32 %v671_v12, 0.0 }
 0x1b5   : > { %v674_v9 = vpop.f32.mrf.mxu1 }
 0x1b6   : > { %v675_v11 = vadd.f32 %v674_v9, %v1496_v43  ;;  %952 = vmatprep.mubr.bf16.mxu0 %v764_v7  ;;  %v738_v17 = vmax.f32 %v673_v10, 0.0 }
 0x1b7   : > { %v676_v13 = vpop.f32.mrf.mxu1  ;;  %953 = vmatmul.mubr.bf16.gmra.mxu0 %v763_v8 }
 0x1b8   : > { %v677_v14 = vadd.f32 %v676_v13, %v1494_v42  ;;  %v739_v15 = vmax.f32 %v675_v11, 0.0 }
 0x1b9   : > { %v680_v16 = vpop.f32.mrf.mxu1 }
 0x1ba   : > { %v740_v18 = vmax.f32 %v677_v14, 0.0  ;;  %v765_v22 = vpack.c.bf16 %v739_v15, %v737_v19  ;;  %v681_v27 = vadd.f32 %v680_v16, %v1496_v43 }
 0x1bb   : > { %v682_v20 = vpop.f32.mrf.mxu1 }
 0x1bc   : > { %v766_v21 = vpack.c.bf16 %v740_v18, %v738_v17  ;;  %v683_v24 = vadd.f32 %v682_v20, %v1494_v42  ;;  %v741_v26 = vmax.f32 %v681_v27, 0.0 }
 0x1bd   : > { %v684_v23 = vpop.f32.mrf.mxu1 }
 0x1be   : > { %v685_v25 = vadd.f32 %v684_v23, %v1496_v43  ;;  %960 = vmatprep.mubr.bf16.mxu0 %v766_v21  ;;  %v742_v32 = vmax.f32 %v683_v24, 0.0 }
 0x1bf   : > { %v686_v28 = vpop.f32.mrf.mxu1  ;;  %961 = vmatmul.mubr.bf16.gmra.mxu0 %v765_v22 }
 0x1c0   : > { %v687_v29 = vadd.f32 %v686_v28, %v1494_v42  ;;  %v743_v30 = vmax.f32 %v685_v25, 0.0 }
 0x1c1   : > { %v690_v31 = vpop.f32.mrf.mxu1 }
 0x1c2   : > { %v744_v33 = vmax.f32 %v687_v29, 0.0  ;;  %v767_v36 = vpack.c.bf16 %v743_v30, %v741_v26  ;;  %v691_v40 = vadd.f32 %v690_v31, %v1496_v43  ;;  %v1534_v31 = vld [vmem:[%s1582_s6] ss:$0 sm:$0xff] }
 0x1c3   : > { %v692_v34 = vpop.f32.mrf.mxu1 }
 0x1c4   : > { %v768_v35 = vpack.c.bf16 %v744_v33, %v742_v32  ;;  %v693_v38 = vadd.f32 %v692_v34, %v1494_v42  ;;  %v745_v49 = vmax.f32 %v691_v40, 0.0 }
 0x1c5   : > { %v694_v37 = vpop.f32.mrf.mxu1 }
 0x1c6   : > { %v695_v39 = vadd.f32 %v694_v37, %v1496_v43  ;;  %968 = vmatprep.mubr.bf16.mxu0 %v768_v35  ;;  %v746_v47 = vmax.f32 %v693_v38, 0.0 }
 0x1c7   : > { %v696_v41 = vpop.f32.mrf.mxu1  ;;  %969 = vmatmul.mubr.bf16.gmra.mxu0 %v767_v36 }
 0x1c8   : > { %v697_v44 = vadd.f32 %v696_v41, %v1494_v42  ;;  %v747_v45 = vmax.f32 %v695_v39, 0.0 }
 0x1c9   : > { %v700_v46 = vpop.f32.mrf.mxu1 }
 0x1ca   : > { %v748_v48 = vmax.f32 %v697_v44, 0.0  ;;  %v769_v52 = vpack.c.bf16 %v747_v45, %v745_v49  ;;  %v701_v56 = vadd.f32 %v700_v46, %v1496_v43 }
 0x1cb   : > { %v702_v50 = vpop.f32.mrf.mxu1 }
 0x1cc   : > { %v770_v51 = vpack.c.bf16 %v748_v48, %v746_v47  ;;  %v703_v54 = vadd.f32 %v702_v50, %v1494_v42  ;;  %v749_v63 = vmax.f32 %v701_v56, 0.0 }
 0x1cd   : > { %v704_v53 = vpop.f32.mrf.mxu1 }
 0x1ce   : > { %v705_v55 = vadd.f32 %v704_v53, %v1496_v43  ;;  %976 = vmatprep.mubr.bf16.mxu0 %v770_v51  ;;  %v750_v61 = vmax.f32 %v703_v54, 0.0 }
 0x1cf   : > { %v706_v57 = vpop.f32.mrf.mxu1  ;;  %977 = vmatmul.mubr.bf16.gmra.mxu0 %v769_v52 }
 0x1d0   : > { %v707_v58 = vadd.f32 %v706_v57, %v1494_v42  ;;  %v751_v59 = vmax.f32 %v705_v55, 0.0 }
 0x1d1   : > { %v710_v60 = vpop.f32.mrf.mxu1 }
 0x1d2   : > { %v752_v62 = vmax.f32 %v707_v58, 0.0  ;;  %v771_v2 = vpack.c.bf16 %v751_v59, %v749_v63  ;;  %v711_v6 = vadd.f32 %v710_v60, %v1496_v43 }
 0x1d3   : > { %v712_v0 = vpop.f32.mrf.mxu1 }
 0x1d4   : > { %v772_v1 = vpack.c.bf16 %v752_v62, %v750_v61  ;;  %v713_v4 = vadd.f32 %v712_v0, %v1494_v42  ;;  %v753_v13 = vmax.f32 %v711_v6, 0.0 }
 0x1d5   : > { %v714_v3 = vpop.f32.mrf.mxu1 }
 0x1d6   : > { %v715_v5 = vadd.f32 %v714_v3, %v1496_v43  ;;  %984 = vmatprep.mubr.bf16.mxu0 %v772_v1  ;;  %v754_v11 = vmax.f32 %v713_v4, 0.0 }
 0x1d7   : > { %v716_v7 = vpop.f32.mrf.mxu1  ;;  %985 = vmatmul.mubr.bf16.gmra.mxu0 %v771_v2 }
 0x1d8   : > { %v717_v8 = vadd.f32 %v716_v7, %v1494_v42  ;;  %v755_v9 = vmax.f32 %v715_v5, 0.0 }
 0x1d9   : > { %v720_v10 = vpop.f32.mrf.mxu1 }
 0x1da   : > { %v756_v12 = vmax.f32 %v717_v8, 0.0  ;;  %v773_v16 = vpack.c.bf16 %v755_v9, %v753_v13  ;;  %v721_v20 = vadd.f32 %v720_v10, %v1496_v43 }
 0x1db   : > { %v722_v14 = vpop.f32.mrf.mxu1 }
 0x1dc   : > { %v774_v15 = vpack.c.bf16 %v756_v12, %v754_v11  ;;  %v723_v18 = vadd.f32 %v722_v14, %v1494_v42  ;;  %v757_v27 = vmax.f32 %v721_v20, 0.0 }
 0x1dd   : > { %v724_v17 = vpop.f32.mrf.mxu1 }
 0x1de   : > { %v725_v19 = vadd.f32 %v724_v17, %v1496_v43  ;;  %992 = vmatprep.mubr.bf16.mxu0 %v774_v15  ;;  %v758_v24 = vmax.f32 %v723_v18, 0.0 }
 0x1df   : > { %v726_v21 = vpop.f32.mrf.mxu1  ;;  %993 = vmatmul.mubr.bf16.gmra.mxu0 %v773_v16 }
 0x1e0   : > { %v727_v22 = vadd.f32 %v726_v21, %v1494_v42  ;;  %v759_v23 = vmax.f32 %v725_v19, 0.0 }
 0x1e2   : > { %v760_v25 = vmax.f32 %v727_v22, 0.0  ;;  %v775_v29 = vpack.c.bf16 %v759_v23, %v757_v27 }
 0x1e4   : > { %v776_v28 = vpack.c.bf16 %v760_v25, %v758_v24 }
 0x1e6   : > { %1000 = vmatprep.mubr.bf16.mxu0 %v776_v28 }
 0x1e7   : > { %1001 = vmatmul.mubr.bf16.gmra.mxu0 %v775_v29 }
 0x26f   : > { %v1170_v30 = vpop.f32.mrf.mxu0 }
 0x271   : > { %v1171_v43 = vpop.f32.mrf.mxu0 }
 0x272   : > { %v1172_v32 = vadd.f32 %v1171_v43, %v1170_v30 }
 0x273   : > { %v1173_v42 = vpop.f32.mrf.mxu0 }
 0x274   : > { %v947_v33 = vadd.f32 %v1172_v32, %v1534_v31 }
 0x275   : > { %v1174_v26 = vpop.f32.mrf.mxu0 }
 0x276   : > { %1009 = vst [vmem:[%s1539_s22] sm:$0xff] %v947_v33  ;;  %v1175_v34 = vadd.f32 %v1174_v26, %v1173_v42 }
 0x277   : > { %v1176_v35 = vpop.f32.mrf.mxu0 }
 0x278   : > { %v950_v36 = vadd.f32 %v1175_v34, %v1534_v31 }
 0x279   : > { %v1177_v37 = vpop.f32.mrf.mxu0 }
 0x27a   : > { %1010 = vst [vmem:[%s1539_s22 + $0x8] sm:$0xff] %v950_v36  ;;  %v1178_v38 = vadd.f32 %v1177_v37, %v1176_v35 }
 0x27b   : > { %v1179_v39 = vpop.f32.mrf.mxu0 }
 0x27c   : > { %v955_v40 = vadd.f32 %v1178_v38, %v1534_v31 }
 0x27d   : > { %v1180_v41 = vpop.f32.mrf.mxu0 }
 0x27e   : > { %1011 = vst [vmem:[%s1539_s22 + $0x10] sm:$0xff] %v955_v40  ;;  %v1181_v44 = vadd.f32 %v1180_v41, %v1179_v39 }
 0x27f   : > { %v1182_v45 = vpop.f32.mrf.mxu0 }
 0x280   : > { %v958_v46 = vadd.f32 %v1181_v44, %v1534_v31 }
 0x281   : > { %v1183_v47 = vpop.f32.mrf.mxu0 }
 0x282   : > { %1012 = vst [vmem:[%s1539_s22 + $0x18] sm:$0xff] %v958_v46  ;;  %v1184_v48 = vadd.f32 %v1183_v47, %v1182_v45 }
 0x283   : > { %v1185_v49 = vpop.f32.mrf.mxu0 }
 0x284   : > { %v963_v50 = vadd.f32 %v1184_v48, %v1534_v31 }
 0x285   : > { %v1186_v51 = vpop.f32.mrf.mxu0 }
 0x286   : > { %1013 = vst [vmem:[%s1539_s22 + $0x20] sm:$0xff] %v963_v50  ;;  %v1187_v52 = vadd.f32 %v1186_v51, %v1185_v49 }
 0x287   : > { %v1188_v53 = vpop.f32.mrf.mxu0 }
 0x288   : > { %v966_v54 = vadd.f32 %v1187_v52, %v1534_v31 }
 0x289   : > { %v1189_v55 = vpop.f32.mrf.mxu0 }
 0x28a   : > { %1014 = vst [vmem:[%s1539_s22 + $0x28] sm:$0xff] %v966_v54  ;;  %v1190_v56 = vadd.f32 %v1189_v55, %v1188_v53 }
 0x28b   : > { %v1191_v57 = vpop.f32.mrf.mxu0 }
 0x28c   : > { %v971_v58 = vadd.f32 %v1190_v56, %v1534_v31 }
 0x28d   : > { %v1192_v59 = vpop.f32.mrf.mxu0 }
 0x28e   : > { %1015 = vst [vmem:[%s1539_s22 + $0x30] sm:$0xff] %v971_v58  ;;  %v1193_v60 = vadd.f32 %v1192_v59, %v1191_v57 }
 0x28f   : > { %v1194_v61 = vpop.f32.mrf.mxu0 }
 0x290   : > { %v974_v62 = vadd.f32 %v1193_v60, %v1534_v31 }
 0x291   : > { %v1195_v63 = vpop.f32.mrf.mxu0 }
 0x292   : > { %1016 = vst [vmem:[%s1539_s22 + $0x38] sm:$0xff] %v974_v62  ;;  %v1196_v0 = vadd.f32 %v1195_v63, %v1194_v61 }
 0x293   : > { %v1197_v1 = vpop.f32.mrf.mxu0 }
 0x294   : > { %v979_v2 = vadd.f32 %v1196_v0, %v1534_v31 }
 0x295   : > { %v1198_v3 = vpop.f32.mrf.mxu0 }
 0x296   : > { %1017 = vst [vmem:[%s1539_s22 + $0x40] sm:$0xff] %v979_v2  ;;  %v1199_v4 = vadd.f32 %v1198_v3, %v1197_v1 }
 0x297   : > { %v1200_v5 = vpop.f32.mrf.mxu0 }
 0x298   : > { %v982_v6 = vadd.f32 %v1199_v4, %v1534_v31 }
 0x299   : > { %v1201_v7 = vpop.f32.mrf.mxu0 }
 0x29a   : > { %1018 = vst [vmem:[%s1539_s22 + $0x48] sm:$0xff] %v982_v6  ;;  %v1202_v8 = vadd.f32 %v1201_v7, %v1200_v5 }
 0x29b   : > { %v1203_v9 = vpop.f32.mrf.mxu0 }
 0x29c   : > { %v987_v10 = vadd.f32 %v1202_v8, %v1534_v31 }
 0x29d   : > { %v1204_v11 = vpop.f32.mrf.mxu0 }
 0x29e   : > { %1019 = vst [vmem:[%s1539_s22 + $0x50] sm:$0xff] %v987_v10  ;;  %v1205_v12 = vadd.f32 %v1204_v11, %v1203_v9 }
 0x29f   : > { %v1206_v13 = vpop.f32.mrf.mxu0 }
 0x2a0   : > { %v990_v14 = vadd.f32 %v1205_v12, %v1534_v31 }
 0x2a1   : > { %v1207_v15 = vpop.f32.mrf.mxu0 }
 0x2a2   : > { %1020 = vst [vmem:[%s1539_s22 + $0x58] sm:$0xff] %v990_v14  ;;  %v1208_v16 = vadd.f32 %v1207_v15, %v1206_v13 }
 0x2a3   : > { %v1209_v17 = vpop.f32.mrf.mxu0 }
 0x2a4   : > { %v995_v18 = vadd.f32 %v1208_v16, %v1534_v31 }
 0x2a5   : > { %v1210_v19 = vpop.f32.mrf.mxu0 }
 0x2a6   : > { %1021 = vst [vmem:[%s1539_s22 + $0x60] sm:$0xff] %v995_v18  ;;  %v1211_v20 = vadd.f32 %v1210_v19, %v1209_v17 }
 0x2a7   : > { %v1212_v21 = vpop.f32.mrf.mxu0 }
 0x2a8   : > { %v998_v22 = vadd.f32 %v1211_v20, %v1534_v31 }
 0x2a9   : > { %v1213_v23 = vpop.f32.mrf.mxu0 }
 0x2aa   : > { %1022 = vst [vmem:[%s1539_s22 + $0x68] sm:$0xff] %v998_v22  ;;  %v1214_v24 = vadd.f32 %v1213_v23, %v1212_v21 }
 0x2ab   : > { %v1215_v25 = vpop.f32.mrf.mxu0 }
 0x2ac   : > { %v1003_v27 = vadd.f32 %v1214_v24, %v1534_v31 }
 0x2ad   : > { %v1216_v28 = vpop.f32.mrf.mxu0 }
 0x2ae   : > { %1023 = vst [vmem:[%s1539_s22 + $0x70] sm:$0xff] %v1003_v27  ;;  %v1217_v29 = vadd.f32 %v1216_v28, %v1215_v25 }
 0x2b0   : > { %v1006_v30 = vadd.f32 %v1217_v29, %v1534_v31 }
 0x2b2   : > { %1024 = vst [vmem:[%s1539_s22 + $0x78] sm:$0xff] %v1006_v30 }
 0x2b3 PF: > { %s17_s24 = sadd.s32 1, %s1303_s24  }
 0x2b4   : > { %p14_p4 = scmp.ge.s32.totalorder %s17_s24, 4  }
 0x2b6   :  { %16 = sbr.rel (!%p14_p4) target bundleno = 1 (0x1), region = 78 }

</bundles_post_ra>
